<compile_context>
chip_gen: v6e
topology: v6e:2x2x1
jax: 0.10.0
libtpu: 0.0.40
codegen_flags: <defaults>
</compile_context>

<pallas_src>
import jax
import jax.numpy as jnp
from jax.experimental import pallas as pl
from jax.experimental.pallas import tpu as pltpu


def _repmlp_matmul_kernel(x_ref, w_ref, b_ref, out_ref, acc_ref):
    """One (tm, tn) output tile, accumulated over the K (= C*h*w) grid axis.

    x_ref  : (tm, tk)  activation tile (compute dtype)
    w_ref  : (tk, tn)  pre-folded, pre-transposed weight tile (compute dtype)
    b_ref  : (1,  tn)  fp32 bias tile
    out_ref: (tm, tn)
    acc_ref: (tm, tn)  fp32 VMEM accumulator (persists across the k axis)
    """
    k = pl.program_id(2)

    # Initialize the accumulator with the bias -> no separate epilogue add.
    @pl.when(k == 0)
    def _():
        acc_ref[...] = jnp.broadcast_to(b_ref[...], acc_ref.shape)

    # Plain (tm,tk) x (tk,tn) MXU matmul, fp32 accumulate.  No RHS transpose needed.
    acc_ref[...] += jnp.dot(x_ref[...], w_ref[...],
                            preferred_element_type=jnp.float32)

    @pl.when(k == pl.num_programs(2) - 1)
    def _():
        out_ref[...] = acc_ref[...].astype(out_ref.dtype)


def fold_repmlp_params(fc_w, fc_b, conv_w, *, compute_dtype=jnp.bfloat16):
    """Fold the 1x1 conv into the FC weight ONCE at parameter-load time.

    With no BN this is exact (it is literally what the module's switch() computes):
        W_eff[o*hw + p, c*hw + q] = fc_w[o*hw + p, c*hw + q] + wc[o, c] * (p == q)

    Returns:
      w_t : (C*h*w, O*h*w)  folded weight, pre-transposed for the MXU, in compute_dtype
      b   : (1, O*h*w)      fp32 bias
    """
    OHW, CHW = fc_w.shape
    O, C = conv_w.shape[0], conv_w.shape[1]
    hw = CHW // C
    assert OHW == O * hw and CHW == C * hw

    wc = conv_w.reshape(O, C).astype(fc_w.dtype)
    # Diagonal add: view fc_w as (O, hw, C, hw) and add wc[o, c] where p == q.
    # No jnp.eye(hw), no weight-sized temporary.
    w4 = fc_w.reshape(O, hw, C, hw)
    r = jnp.arange(hw)
    w4 = w4.at[:, r, :, r].add(wc[None, :, :])          # update shape (hw, O, C)
    w_t = w4.reshape(OHW, CHW).T.astype(compute_dtype)  # (CHW, OHW): (tm,tk)x(tk,tn) layout
    b = fc_b.reshape(1, OHW).astype(jnp.float32)        # bias add stays fp32
    return w_t, b


def _pick_tile(dim, candidates):
    for t in candidates:
        if dim % t == 0:
            return t
    return dim  # fall back to the full dimension (always a legal block)


def repmlp_no_bn(x, w_t, b):
    """RepMlp_no_Bn forward with pre-folded params (see fold_repmlp_params).

    x   : (N, C, h, w)      NCHW input
    w_t : (C*h*w, O*h*w)    folded + pre-transposed weight (compute dtype)
    b   : (1, O*h*w)        fp32 bias
    Returns (N, O, h, w) in x.dtype.
    """
    N, C, h, w = x.shape
    CHW, OHW = w_t.shape
    hw = h * w
    assert CHW == C * hw
    O = OHW // hw
    compute_dtype = w_t.dtype

    x_flat = x.reshape(N, CHW).astype(compute_dtype)

    w_item = jnp.dtype(compute_dtype).itemsize
    out_item = jnp.dtype(x.dtype).itemsize

    # --- Tile sizes ---
    # tm: up to 512 rows so batched inputs don't re-stream the full weight per 128 rows.
    tm = N if N <= 512 else _pick_tile(N, (512, 256, 128, 64, 32, 16, 8))
    n_i = pl.cdiv(N, tm)
    # tn: lane-dense; if the batch axis gives no grid parallelism, keep grid_j >= 2 so
    #     v7x megacore can shard the OHW axis across its two TensorCores.
    tn_cands = [t for t in (1024, 512, 256, 128) if OHW % t == 0]
    if not tn_cands:
        tn = OHW
    elif n_i == 1:
        tn = next((t for t in tn_cands if OHW // t >= 2), tn_cands[0])
    else:
        tn = tn_cands[0]
    # tk: as large as possible with the streamed weight tile <= 4 MiB (amortizes the
    #     ~0.35 us per-grid-step overhead that dominates 1 MiB tiles on fast-HBM chips).
    tk = next((t for t in (2048, 1024, 512, 256, 128)
               if CHW % t == 0 and t * tn * w_item <= (4 << 20)), CHW)

    grid = (n_i, pl.cdiv(OHW, tn), pl.cdiv(CHW, tk))

    # Deeper buffering on the weight stream: per-tile compute (tiny M) cannot hide DMA
    # latency with only 2 buffers.  Only engage when the grid is long enough to matter.
    w_buffers = 3 if (grid[0] * grid[1] * grid[2]) >= 3 else 2
    w_spec = pl.BlockSpec((tk, tn), lambda i, j, k: (k, j))
    if w_buffers > 2:
        w_spec = pl.BlockSpec((tk, tn), lambda i, j, k: (k, j),
                              pipeline_mode=pl.Buffered(w_buffers))

    # Only override the scoped-VMEM limit when we'd approach v5e's 16 MiB default.
    vmem_need = (w_buffers * tk * tn * w_item        # weight buffers
                 + 2 * tm * tk * w_item              # activation double-buffer
                 + 2 * tm * tn * out_item            # output double-buffer
                 + tm * tn * 4                       # fp32 accumulator
                 + 2 * tn * 4)                       # bias
    vmem_limit = None
    if 2 * vmem_need > (14 << 20):
        vmem_limit = int(min(48 << 20, 2 * vmem_need))

    cost = pl.CostEstimate(
        flops=2 * N * CHW * OHW,
        transcendentals=0,
        bytes_accessed=(OHW * CHW * w_item * grid[0]     # weight, re-streamed per i-block
                        + N * CHW * w_item * grid[1]     # activations, re-read per j-block
                        + OHW * 4                        # bias
                        + N * OHW * out_item))           # output

    out_flat = pl.pallas_call(
        _repmlp_matmul_kernel,
        out_shape=jax.ShapeDtypeStruct((N, OHW), x.dtype),
        grid_spec=pltpu.PrefetchScalarGridSpec(
            num_scalar_prefetch=0,
            grid=grid,
            in_specs=[
                pl.BlockSpec((tm, tk), lambda i, j, k: (i, k)),   # activations
                w_spec,                                           # folded weight (in, out)
                pl.BlockSpec((1, tn), lambda i, j, k: (0, j)),    # fp32 bias
            ],
            out_specs=pl.BlockSpec((tm, tn), lambda i, j, k: (i, j)),
            scratch_shapes=[pltpu.VMEM((tm, tn), jnp.float32)],
        ),
        compiler_params=pltpu.CompilerParams(
            dimension_semantics=("parallel", "parallel", "arbitrary"),
            vmem_limit_bytes=vmem_limit),
        cost_estimate=cost,
    )(x_flat, w_t, b)

    return out_flat.reshape(N, O, h, w)


def repmlp_reference(x, fc_w, fc_b, conv_w):
    """Pure-JAX reference matching the torch non-deploy forward exactly."""
    N, C, h, w = x.shape
    OHW = fc_w.shape[0]
    O = OHW // (h * w)
    fc_res = (x.reshape(N, C * h * w) @ fc_w.T + fc_b).reshape(N, O, h, w)
    conv_res = jnp.einsum('oc,nchw->nohw', conv_w.reshape(O, C), x)
    return conv_res + fc_res


if __name__ == "__main__":
    # Small shapes consistent with the module: N=2, C=4, O=4, h=w=16 (CHW = OHW = 1024).
    N, C, O, h, w = 2, 4, 4, 16, 16
    key = jax.random.PRNGKey(0)
    k_x, k_w, k_b, k_c = jax.random.split(key, 4)

    # Deterministic parameter init mirroring torch defaults (uniform, fan-in bound).
    fan_in_fc = C * h * w
    bound_fc = 1.0 / (fan_in_fc ** 0.5)
    fc_w = jax.random.uniform(k_w, (O * h * w, C * h * w), jnp.float32, -bound_fc, bound_fc)
    fc_b = jax.random.uniform(k_b, (O * h * w,), jnp.float32, -bound_fc, bound_fc)
    bound_cv = 1.0 / (C ** 0.5)
    conv_w = jax.random.uniform(k_c, (O, C, 1, 1), jnp.float32, -bound_cv, bound_cv)

    x = jax.random.normal(k_x, (N, C, h, w), jnp.float32)

    ref = repmlp_reference(x, fc_w, fc_b, conv_w)

    # fp32 weight path: tight check against the reference.
    w_t32, b32 = fold_repmlp_params(fc_w, fc_b, conv_w, compute_dtype=jnp.float32)
    out = jax.block_until_ready(repmlp_no_bn(x, w_t32, b32))
    assert out.shape == (N, O, h, w)
    assert jnp.allclose(out, ref, atol=1e-4, rtol=1e-4), "fp32 mismatch vs reference"

    # Default bf16 streamed weight/activations (fp32 accumulate + bias): loose check.
    # Note: rounding now happens once at fold time instead of per call (expected).
    w_t16, b16 = fold_repmlp_params(fc_w, fc_b, conv_w)
    out_bf16 = jax.block_until_ready(repmlp_no_bn(x, w_t16, b16))
    assert jnp.allclose(out_bf16, ref, atol=5e-2, rtol=5e-2), "bf16 mismatch vs reference"

    print("KERNEL_OK")
</pallas_src>

<mosaic_0001>
module attributes {stable_mosaic.version = 11 : i64} {
  func.func @_repmlp_matmul_kernel(%arg0: i32, %arg1: i32, %arg2: i32, %arg3: memref<2x1024xf32, #tpu.memory_space<vmem>>, %arg4: memref<1024x512xf32, #tpu.memory_space<vmem>>, %arg5: memref<1x512xf32, #tpu.memory_space<vmem>>, %arg6: memref<2x512xf32, #tpu.memory_space<vmem>>, %arg7: memref<2x512xf32, #tpu.memory_space<vmem>>) attributes {dimension_semantics = [#tpu.dimension_semantics<parallel>, #tpu.dimension_semantics<parallel>, #tpu.dimension_semantics<arbitrary>], iteration_bounds = array<i64: 1, 2, 1>, scalar_prefetch = 0 : i64, scratch_operands = 1 : i64, tpu.core_type = #tpu.core_type<tc>, window_params = [{transform_indices = @transform_0, window_bounds = array<i64: 2, 1024>}, {transform_indices = @transform_1, window_bounds = array<i64: 1024, 512>}, {transform_indices = @transform_2, window_bounds = array<i64: 1, 512>}, {transform_indices = @transform_3, window_bounds = array<i64: 2, 512>}]} {
    %c0_i32 = arith.constant 0 : i32
    %0 = arith.cmpi eq, %arg2, %c0_i32 : i32
    %1 = arith.extui %0 : i1 to i32
    %c0_i32_0 = arith.constant 0 : i32
    %2 = arith.cmpi ne, %1, %c0_i32_0 : i32
    scf.if %2 {
      %c0_10 = arith.constant 0 : index
      %c0_11 = arith.constant 0 : index
      %12 = vector.load %arg5[%c0_10, %c0_11] : memref<1x512xf32, #tpu.memory_space<vmem>>, vector<1x512xf32>
      %13 = vector.shape_cast %12 : vector<1x512xf32> to vector<1x512xf32>
      %14 = vector.broadcast %13 : vector<1x512xf32> to vector<2x512xf32>
      %c0_12 = arith.constant 0 : index
      %c0_13 = arith.constant 0 : index
      %15 = vector.load %arg7[%c0_12, %c0_13] : memref<2x512xf32, #tpu.memory_space<vmem>>, vector<2x512xf32>
      tpu.vector_store %arg7[%c0_12, %c0_13], %14 {strides = array<i32>} : memref<2x512xf32, #tpu.memory_space<vmem>>, vector<2x512xf32>,
    } else {
    }
    %c0 = arith.constant 0 : index
    %c0_1 = arith.constant 0 : index
    %3 = vector.load %arg7[%c0, %c0_1] : memref<2x512xf32, #tpu.memory_space<vmem>>, vector<2x512xf32>
    %c0_2 = arith.constant 0 : index
    %c0_3 = arith.constant 0 : index
    %4 = vector.load %arg3[%c0_2, %c0_3] : memref<2x1024xf32, #tpu.memory_space<vmem>>, vector<2x1024xf32>
    %c0_4 = arith.constant 0 : index
    %c0_5 = arith.constant 0 : index
    %5 = vector.load %arg4[%c0_4, %c0_5] : memref<1024x512xf32, #tpu.memory_space<vmem>>, vector<1024x512xf32>
    %cst = arith.constant dense<0.000000e+00> : vector<2x512xf32>
    %6 = tpu.matmul %4, %5, %cst {dimension_numbers = #tpu.dot_dimension_numbers<[1], [0], [0], [1], [0, 0, 1, 1], [], []>} : vector<2x1024xf32>, vector<1024x512xf32>, vector<2x512xf32> -> vector<2x512xf32>
    %7 = arith.addf %3, %6 : vector<2x512xf32>
    %c0_6 = arith.constant 0 : index
    %c0_7 = arith.constant 0 : index
    %8 = vector.load %arg7[%c0_6, %c0_7] : memref<2x512xf32, #tpu.memory_space<vmem>>, vector<2x512xf32>
    tpu.vector_store %arg7[%c0_6, %c0_7], %7 {strides = array<i32>} : memref<2x512xf32, #tpu.memory_space<vmem>>, vector<2x512xf32>,
    %c0_i32_8 = arith.constant 0 : i32
    %9 = arith.cmpi eq, %arg2, %c0_i32_8 : i32
    %10 = arith.extui %9 : i1 to i32
    %c0_i32_9 = arith.constant 0 : i32
    %11 = arith.cmpi ne, %10, %c0_i32_9 : i32
    scf.if %11 {
      %c0_10 = arith.constant 0 : index
      %c0_11 = arith.constant 0 : index
      %12 = vector.load %arg7[%c0_10, %c0_11] : memref<2x512xf32, #tpu.memory_space<vmem>>, vector<2x512xf32>
      %c0_12 = arith.constant 0 : index
      %c0_13 = arith.constant 0 : index
      %13 = vector.load %arg6[%c0_12, %c0_13] : memref<2x512xf32, #tpu.memory_space<vmem>>, vector<2x512xf32>
      tpu.vector_store %arg6[%c0_12, %c0_13], %12 {strides = array<i32>} : memref<2x512xf32, #tpu.memory_space<vmem>>, vector<2x512xf32>,
    } else {
    }
    return
  }
  func.func @transform_0(%arg0: i32, %arg1: i32, %arg2: i32) -> (i32, i32) {
    %c0_i32 = arith.constant 0 : i32
    return %arg0, %arg2 : i32, i32
  }
  func.func @transform_1(%arg0: i32, %arg1: i32, %arg2: i32) -> (i32, i32) {
    %c0_i32 = arith.constant 0 : i32
    return %arg2, %arg1 : i32, i32
  }
  func.func @transform_2(%arg0: i32, %arg1: i32, %arg2: i32) -> (i32, i32) {
    %c0_i32 = arith.constant 0 : i32
    %c0_i32_0 = arith.constant 0 : i32
    return %c0_i32, %arg1 : i32, i32
  }
  func.func @transform_3(%arg0: i32, %arg1: i32, %arg2: i32) -> (i32, i32) {
    %c0_i32 = arith.constant 0 : i32
    return %arg0, %arg1 : i32, i32
  }
}

</mosaic_0001>

<bundles_post_ra>
// kernel: tpu_custom_call.1
= control target key start
LH: loop header
LB: loop body
LE: loop exit
PB: predicated region body
PF: predicated region fallthrough
CT: control target
= control target key end

     0   :  { %s2684_s0 = inlined_call_operand.hbm [shape: f32[2,1024], index: 0, kind: input, shape index: {}]   ;;  %s2685_s1 = inlined_call_operand.hbm [shape: f32[1024,1024], index: 1, kind: input, shape index: {}]   ;;  %s2686_s2 = inlined_call_operand.hbm [shape: f32[1,1024], index: 2, kind: input, shape index: {}]   ;;  %s2687_s3 = inlined_call_operand.hbm [shape: f32[2,1024], index: 3, kind: output, shape index: {}]  }
   0x1   :  { %2691 = sst [smem:[#allocation13_spill]] %s2685_s1 }
   0x2   :  { %8 = vsyncpa [#allocation4], 0 }
   0x3   :  { %9 = vsyncpa [#allocation7], 0 }
   0x4   :  { %11 = vsyncpa [#allocation7 + $0x1], 0 }
   0x5   :  { %12 = vsyncpa [#allocation5], 0 }
   0x6   :  { %14 = vsyncpa [#allocation5 + $0x1], 0  ;;  %s1922_s12 = smov 0   ;;  %s1924_s13 = smov 0  }
   0x7   :  { %s1926_s14 = smov 0   ;;  %s1928_s15 = smov 0  }
   0x8   :  { %s1930_s16 = smov 0   ;;  %s1932_s17 = smov 0  }
   0x9 LB: > { %s35_s18 = sadd.s32 1, %s1888_s16  ;;  %s76_s19 = sadd.s32 1, %s1880_s14  ;;  %s1892_s17 = sphi %s1932_s17, %s20_s17   ;;  %s1888_s16 = sphi %s1930_s16, %s2709_s16   ;;  %s1884_s15 = sphi %s1928_s15, %s2708_s15   ;;  %s1880_s14 = sphi %s1926_s14, %s2707_s14   ;;  %s1876_s13 = sphi %s1924_s13, %s2706_s13   ;;  %s1872_s12 = sphi %s1922_s12, %s2705_s12  }
   0xa   : > { %p37_p0 = scmp.ge.s32.totalorder %s35_s18, 2  ;;  %p83_p1 = scmp.ne.s32.totalorder %s1880_s14, %s1876_s13 }
   0xb   : > { %p84_p2 = scmp.eq.s32.totalorder %s1892_s17, 0  ;;  %p1668_p5 = scmp.lt.s32.totalorder %s1892_s17, 2 }
   0xc   : > { %s2711_s18 = smov (%p37_p0, %s35_s18), 0  ;;  %s183_s21 = sand.u32 1, %s1892_s17  }
   0xd   : > { %p85_p4 = por %p84_p2, %p83_p1  ;;  %s72_s20 = ssub.s32 %s1888_s16, %s2711_s18 }
   0xe   : > { %p74_p6 = scmp.eq.s32.totalorder %s72_s20, 0  ;;  %s185_s22 = sand.u32 1, %s1880_s14  }
   0xf   : > { %s1639_s23 = sshll.u32 %s1888_s16, 9  ;;  %s1623_s25 = sshll.u32 %s185_s22, 12 }
  0x10   : > { %s1970_s24 = scalar_select %p74_p6, %s1880_s14, %s76_s19  }
  0x11   : > { %s2692_s1 = sld [smem:[#allocation13_spill]]  ;;  %p1977_p7 = pnand %p1668_p5, %p85_p4 }
  0x12   : > { %s187_s30 = scalar_lea.vmem [#allocation6], %s1623_s25  ;;  %s1981_s5 = scalar_lea.sflag [#allocation7], %s183_s21 }
  0x13   : > { %s197_s4 = sshll.u32 %s187_s30, 4  ;;  %p1728_p8 = pneg %p1977_p7  ;;  %s198_s4 = int_to_ptr.vmem [resolvable:$true] %s197_s4 }
  0x14   : > { %s1739_s6 = scalar_lea.vmem %s198_s4, 65536  ;;  %s1894_s7 = smov [#allocation6]  }
  0x15   : > { %p1740_p9 = scmp.ne.s32.totalorder %s198_s4, %s1739_s6  ;;  %s1744_s8 = sshll.u32 %s1894_s7, 4  ;;  %s1745_s8 = int_to_ptr.vmem [resolvable:$false] %s1744_s8 }
  0x16   : > { %s1746_s9 = scalar_lea.vmem %s1745_s8, 131072  ;;  %p1747_p12 = scmp.lt.s32.totalorder %s198_s4, %s1745_s8 }
  0x17   : > { %s196_s28 = scalar_lea.hbm %s2692_s1, %s1639_s23  ;;  %p1742_p10 = pnand %p1740_p9, %p1728_p8 }
  0x18   : > { %p1748_p13 = scmp.lt.s32.totalorder %s1746_s9, %s1739_s6 }
  0x19   : > { %p1743_p11 = pneg %p1742_p10 }
  0x1a   : > { %p1749_p0 = por %p1748_p13, %p1747_p12 }
  0x1c   : > { %p1750_p2 = pnand %p1749_p0, %p1743_p11 }
  0x1e   : > { %1753 = shalt.err (!%p1750_p2)
}
  0x1f   : > { %s1895_s10 = smov 1024   ;;  %s1896_s11 = smov 512  }
  0x20   : > { %s1897_s19 = smov 32   ;;  %s1992_s20 = sadd.s32 4294967295, %s1892_s17  }
  0x21   : > { %1659 = dma.hbm_to_vmem [thread:$0]  (!%p1977_p7), %s196_s28, 65536, %s198_s4, %s1981_s5, %s1895_s10, %s1896_s11, %s1897_s19  }
  0x22   : > { %s1619_s21 = sadd.s32 4294967294, %s1892_s17   ;;  %p89_p4 = scmp.ne.s32.totalorder %s1876_s13, %s1872_s12 }
  0x23   : > { %p2689_p5 = scmp.eq.s32.totalorder %s1992_s20, 0  ;;  %p141_p6 = scmp.eq.s32.totalorder %s1992_s20, 1 }
  0x24   : > { %p147_p9 = scmp.eq.s32.totalorder %s1619_s21, 1  ;;  %p1620_p11 = scmp.ge.s32.totalorder %s1892_s17, 1 }
  0x25   : > { %p2001_p10 = por %p2689_p5, %p89_p4  ;;  %p2009_p12 = por %p141_p6, %p83_p1 }
  0x26   : > { %p2013_p13 = por %p147_p9, %p89_p4  ;;  %p154_p0 = scmp.lt.s32.totalorder %s1892_s17, 3 }
  0x27   : > { %s2694_s23 = scalar_select %p2001_p10, 1, 0 }
  0x28   : > { %s2695_s25 = scalar_select %p2009_p12, 1, 0 }
  0x29   : > { %s2696_s26 = scalar_select %p2013_p13, 1, 0 }
  0x2a   : > { %s1626_s27 = sshll.u32 %s185_s22, 2  ;;  %p2020_p2 = pnand %p1620_p11, %p154_p0 }
  0x2b   : > { %s1898_s30 = smov [#allocation3]   ;;  %s1640_s6 = sshll.u32 %s1888_s16, 6 }
  0x2c   : > { %s172_s4 = sshll.u32 %s1898_s30, 4  ;;  %p1652_p1 = pneg %p2020_p2  ;;  %s2024_s4 = int_to_ptr.vmem [resolvable:$true] %s172_s4 }
  0x2d   : > { %s217_s9 = scalar_lea.hbm %s2686_s2, %s1640_s6  ;;  %s211_s10 = scalar_lea.vmem [#allocation8], %s1626_s27 }
  0x2e   : > { %s219_s11 = sshll.u32 %s211_s10, 4  ;;  %p2034_p4 = pnand %p1652_p1, %p2689_p5  ;;  %s220_s11 = int_to_ptr.vmem [resolvable:$true] %s219_s11 }
  0x2f   : > { %s1767_s19 = scalar_lea.vmem %s220_s11, 64  ;;  %s1899_s21 = smov [#allocation8]  }
  0x30   : > { %p1768_p6 = scmp.ne.s32.totalorder %s220_s11, %s1767_s19  ;;  %s1772_s30 = sshll.u32 %s1899_s21, 4  ;;  %s1773_s30 = int_to_ptr.vmem [resolvable:$false] %s1772_s30 }
  0x31   : > { %s1774_s1 = scalar_lea.vmem %s1773_s30, 128  ;;  %p1775_p0 = scmp.lt.s32.totalorder %s220_s11, %s1773_s30 }
  0x32   : > { %p1770_p9 = pnand %p1768_p6, %p1728_p8  ;;  %p1776_p3 = scmp.lt.s32.totalorder %s1774_s1, %s1767_s19 }
  0x34   : > { %p1771_p11 = pneg %p1770_p9  ;;  %p1777_p13 = por %p1776_p3, %p1775_p0 }
  0x36   : > { %p1778_p12 = pnand %p1777_p13, %p1771_p11 }
  0x38   : > { %1781 = shalt.err (!%p1778_p12)
}
  0x39   : > { %1662 = dma.hbm_to_vmem [thread:$0]  (!%p1977_p7), %s217_s9, 64, %s220_s11, %s1981_s5  }
  0x3a   : > { %p1784_p8 = pneg %p2034_p4  ;;  %s1793_s27 = scalar_lea.vmem %s2024_s4, 256 }
  0x3b   : > { %p1794_p1 = scmp.ne.s32.totalorder %s2024_s4, %s1793_s27  ;;  %p1801_p5 = scmp.lt.s32.totalorder %s2024_s4, %s2024_s4 }
  0x3c   : > { %p1802_p10 = scmp.lt.s32.totalorder %s1793_s27, %s1793_s27 }
  0x3d   : > { %p1796_p6 = pnand %p1794_p1, %p1784_p8 }
  0x3e   : > { %p1803_p3 = por %p1802_p10, %p1801_p5 }
  0x3f   : > { %p1797_p9 = pneg %p1796_p6 }
  0x41   : > { %p1804_p13 = pnand %p1803_p3, %p1797_p9 }
  0x43   : > { %1807 = shalt.err (!%p1804_p13)
}
  0x44   : > { %1655 = dma.hbm_to_vmem [thread:$0]  (!%p2034_p4), %s2684_s0, 256, %s2024_s4, [#allocation4]  }
  0x45   : > { %228 = sbr.rel (%p2020_p2) target bundleno = 564 (0x234), region = 32  ;;  %p2699_p7 = scmp.eq.s32.totalorder (!%p2020_p2), %s1992_s20, 0 }
  0x4a   : > { %1859 = dma.done.wait (%p2699_p7), [#allocation4], 256   ;;  %p2700_p12 = pmov %p2699_p7 }
  0x4b   : > { %s234_s5 = sand.u32 1, %s1992_s20   ;;  %s2064_s6 = sand.u32 1, %s1876_s13  }
  0x4c   : > { %1861 = vsyncadd (%p2700_p12), [#allocation4], 4294967040  ;;  %s1631_s7 = sshll.u32 %s2064_s6, 12  ;;  %s235_s8 = scalar_lea.sflag [#allocation7], %s234_s5 }
  0x4d   : > { %s2067_s9 = scalar_lea.vmem [#allocation6], %s1631_s7  ;;  %p2701_p5 = scmp.ne.s32.totalorder %s2694_s23, 0 }
  0x4f   : > { %1863 = dma.done.wait (%p2701_p5), %s235_s8, 65600  }
  0x50   : > { %1865 = vsyncadd (%p2701_p5), %s235_s8, 4294901696  ;;  %v385_v0 = vld [vmem:[%s2067_s9 + $0x1e8] sm:$0xff]  ;;  %v384_v2 = vld [vmem:[%s2067_s9 + $0x1e0] sm:$0xff]  ;;  %s1632_s20 = sshll.u32 %s2064_s6, 2  ;;  %s1633_s28 = sshll.u32 %s2064_s6, 3 }
  0x51   : > { %v513_v1 = vld [vmem:[%s2067_s9 + $0x5e8] sm:$0xff]  ;;  %880 = vmatprep.subr.mxu0 %v385_v0  ;;  %v512_v3 = vld [vmem:[%s2067_s9 + $0x5e0] sm:$0xff]  ;;  %s247_s23 = scalar_lea.vmem [#allocation8], %s1632_s20  ;;  %s1641_s4 = sshll.u32 %s1884_s15, 7 }
  0x52   : > { %951 = vmatprep.subr.mxu1 %v513_v1  ;;  %v381_v4 = vld [vmem:[%s2067_s9 + $0x1c8] sm:$0xff]  ;;  %881 = vmatpush1.msra.mxu0 %v384_v2  ;;  %v380_v6 = vld [vmem:[%s2067_s9 + $0x1c0] sm:$0xff]  ;;  %s274_s10 = scalar_lea.vmem [#allocation9], %s1633_s28  ;;  %s1492_s21 = scalar_lea.hbm %s2687_s3, %s1641_s4 }
  0x53   : > { %v509_v5 = vld [vmem:[%s2067_s9 + $0x5c8] sm:$0xff]  ;;  %952 = vmatpush1.msra.mxu1 %v512_v3  ;;  %v508_v7 = vld [vmem:[%s2067_s9 + $0x5c0] sm:$0xff]  ;;  %882 = vmatprep.subr.mxu0 %v381_v4  ;;  %s1494_s11 = sshll.u32 %s274_s10, 4  ;;  %s1478_s30 = scalar_lea.sflag [#allocation5], %s2064_s6  ;;  %s1495_s11 = int_to_ptr.vmem [resolvable:$true] %s1494_s11 }
  0x54   : > { %v377_v8 = vld [vmem:[%s2067_s9 + $0x1a8] sm:$0xff]  ;;  %953 = vmatprep.subr.mxu1 %v509_v5  ;;  %v376_v10 = vld [vmem:[%s2067_s9 + $0x1a0] sm:$0xff]  ;;  %883 = vmatpush1.msra.mxu0 %v380_v6  ;;  %s1808_s27 = scalar_lea.vmem %s1495_s11, 128  ;;  %p2702_p2 = scmp.ne.s32.totalorder %s2695_s25, 0 }
  0x55   : > { %v505_v9 = vld [vmem:[%s2067_s9 + $0x5a8] sm:$0xff]  ;;  %v504_v11 = vld [vmem:[%s2067_s9 + $0x5a0] sm:$0xff]  ;;  %954 = vmatpush1.msra.mxu1 %v508_v7  ;;  %884 = vmatprep.subr.mxu0 %v377_v8  ;;  %p1809_p10 = scmp.ne.s32.totalorder %s1495_s11, %s1808_s27  ;;  %s1901_s1 = smov [#allocation9]  }
  0x56   : > { %v373_v12 = vld [vmem:[%s2067_s9 + $0x188] sm:$0xff]  ;;  %955 = vmatprep.subr.mxu1 %v505_v9  ;;  %v372_v14 = vld [vmem:[%s2067_s9 + $0x180] sm:$0xff]  ;;  %885 = vmatpush1.msra.mxu0 %v376_v10  ;;  %s1812_s29 = sshll.u32 %s1901_s1, 4  ;;  %s1813_s29 = int_to_ptr.vmem [resolvable:$false] %s1812_s29 }
  0x57   : > { %v501_v13 = vld [vmem:[%s2067_s9 + $0x588] sm:$0xff]  ;;  %v500_v15 = vld [vmem:[%s2067_s9 + $0x580] sm:$0xff]  ;;  %956 = vmatpush1.msra.mxu1 %v504_v11  ;;  %886 = vmatprep.subr.mxu0 %v373_v12  ;;  %p1810_p4 = pnand %p1809_p10, %p2702_p2  ;;  %s1814_s15 = scalar_lea.vmem %s1813_s29, 256 }
  0x58   : > { %v369_v16 = vld [vmem:[%s2067_s9 + $0x168] sm:$0xff]  ;;  %957 = vmatprep.subr.mxu1 %v501_v13  ;;  %v368_v18 = vld [vmem:[%s2067_s9 + $0x160] sm:$0xff]  ;;  %887 = vmatpush1.msra.mxu0 %v372_v14  ;;  %p1815_p0 = scmp.lt.s32.totalorder %s1495_s11, %s1813_s29  ;;  %p1816_p8 = scmp.lt.s32.totalorder %s1814_s15, %s1808_s27 }
  0x59   : > { %v497_v17 = vld [vmem:[%s2067_s9 + $0x568] sm:$0xff]  ;;  %v496_v19 = vld [vmem:[%s2067_s9 + $0x560] sm:$0xff]  ;;  %958 = vmatpush1.msra.mxu1 %v500_v15  ;;  %888 = vmatprep.subr.mxu0 %v369_v16  ;;  %p1811_p11 = pneg %p1810_p4 }
  0x5a   : > { %v365_v20 = vld [vmem:[%s2067_s9 + $0x148] sm:$0xff]  ;;  %959 = vmatprep.subr.mxu1 %v497_v17  ;;  %v364_v22 = vld [vmem:[%s2067_s9 + $0x140] sm:$0xff]  ;;  %889 = vmatpush1.msra.mxu0 %v368_v18  ;;  %p1817_p1 = por %p1816_p8, %p1815_p0 }
  0x5b   : > { %v493_v21 = vld [vmem:[%s2067_s9 + $0x548] sm:$0xff]  ;;  %v492_v23 = vld [vmem:[%s2067_s9 + $0x540] sm:$0xff]  ;;  %960 = vmatpush1.msra.mxu1 %v496_v19  ;;  %890 = vmatprep.subr.mxu0 %v365_v20 }
  0x5c   : > { %v361_v24 = vld [vmem:[%s2067_s9 + $0x128] sm:$0xff]  ;;  %961 = vmatprep.subr.mxu1 %v493_v21  ;;  %v360_v26 = vld [vmem:[%s2067_s9 + $0x120] sm:$0xff]  ;;  %891 = vmatpush1.msra.mxu0 %v364_v22  ;;  %p1818_p6 = pnand %p1817_p1, %p1811_p11 }
  0x5d   : > { %v489_v25 = vld [vmem:[%s2067_s9 + $0x528] sm:$0xff]  ;;  %v488_v27 = vld [vmem:[%s2067_s9 + $0x520] sm:$0xff]  ;;  %962 = vmatpush1.msra.mxu1 %v492_v23  ;;  %892 = vmatprep.subr.mxu0 %v361_v24 }
  0x5e   : > { %v357_v28 = vld [vmem:[%s2067_s9 + $0x108] sm:$0xff]  ;;  %963 = vmatprep.subr.mxu1 %v489_v25  ;;  %v356_v30 = vld [vmem:[%s2067_s9 + $0x100] sm:$0xff]  ;;  %893 = vmatpush1.msra.mxu0 %v360_v26 }
  0x5f   : > { %v485_v29 = vld [vmem:[%s2067_s9 + $0x508] sm:$0xff]  ;;  %v484_v31 = vld [vmem:[%s2067_s9 + $0x500] sm:$0xff]  ;;  %964 = vmatpush1.msra.mxu1 %v488_v27  ;;  %894 = vmatprep.subr.mxu0 %v357_v28 }
  0x60   : > { %v353_v32 = vld [vmem:[%s2067_s9 + $0xe8] sm:$0xff]  ;;  %965 = vmatprep.subr.mxu1 %v485_v29  ;;  %v352_v34 = vld [vmem:[%s2067_s9 + $0xe0] sm:$0xff]  ;;  %895 = vmatpush1.msra.mxu0 %v356_v30  ;;  %v286_v30 = vlaneseq }
  0x61   : > { %v481_v33 = vld [vmem:[%s2067_s9 + $0x4e8] sm:$0xff]  ;;  %v480_v35 = vld [vmem:[%s2067_s9 + $0x4e0] sm:$0xff]  ;;  %966 = vmatpush1.msra.mxu1 %v484_v31  ;;  %896 = vmatprep.subr.mxu0 %v353_v32  ;;  %v1900_v31 = vmov 1983009808  }
  0x62   : > { %v349_v36 = vld [vmem:[%s2067_s9 + $0xc8] sm:$0xff]  ;;  %967 = vmatprep.subr.mxu1 %v481_v33  ;;  %v348_v38 = vld [vmem:[%s2067_s9 + $0xc0] sm:$0xff]  ;;  %897 = vmatpush1.msra.mxu0 %v352_v34  ;;  %v305_v32 = vunpack.c.l.s4 %v1900_v31 }
  0x63   : > { %v477_v37 = vld [vmem:[%s2067_s9 + $0x4c8] sm:$0xff]  ;;  %v476_v39 = vld [vmem:[%s2067_s9 + $0x4c0] sm:$0xff]  ;;  %968 = vmatpush1.msra.mxu1 %v480_v35  ;;  %898 = vmatprep.subr.mxu0 %v349_v36 }
  0x64   : > { %v345_v40 = vld [vmem:[%s2067_s9 + $0xa8] sm:$0xff]  ;;  %969 = vmatprep.subr.mxu1 %v477_v37  ;;  %v344_v42 = vld [vmem:[%s2067_s9 + $0xa0] sm:$0xff]  ;;  %899 = vmatpush1.msra.mxu0 %v348_v38 }
  0x65   : > { %v473_v41 = vld [vmem:[%s2067_s9 + $0x4a8] sm:$0xff]  ;;  %v472_v43 = vld [vmem:[%s2067_s9 + $0x4a0] sm:$0xff]  ;;  %970 = vmatpush1.msra.mxu1 %v476_v39  ;;  %900 = vmatprep.subr.mxu0 %v345_v40 }
  0x66   : > { %v341_v44 = vld [vmem:[%s2067_s9 + $0x88] sm:$0xff]  ;;  %971 = vmatprep.subr.mxu1 %v473_v41  ;;  %v340_v46 = vld [vmem:[%s2067_s9 + $0x80] sm:$0xff]  ;;  %901 = vmatpush1.msra.mxu0 %v344_v42  ;;  %v2175_v41 = vshrl.u32 %v286_v30, 7  ;;  %v306_v42 = vunpack.c.0.s8 %v305_v32 }
  0x67   : > { %v469_v45 = vld [vmem:[%s2067_s9 + $0x488] sm:$0xff]  ;;  %v468_v47 = vld [vmem:[%s2067_s9 + $0x480] sm:$0xff]  ;;  %972 = vmatpush1.msra.mxu1 %v472_v43  ;;  %902 = vmatprep.subr.mxu0 %v341_v44 }
  0x68   : > { %v337_v48 = vld [vmem:[%s2067_s9 + $0x68] sm:$0xff]  ;;  %973 = vmatprep.subr.mxu1 %v469_v45  ;;  %v336_v50 = vld [vmem:[%s2067_s9 + $0x60] sm:$0xff]  ;;  %903 = vmatpush1.msra.mxu0 %v340_v46 }
  0x69   : > { %v465_v49 = vld [vmem:[%s2067_s9 + $0x468] sm:$0xff]  ;;  %v464_v51 = vld [vmem:[%s2067_s9 + $0x460] sm:$0xff]  ;;  %974 = vmatpush1.msra.mxu1 %v468_v47  ;;  %904 = vmatprep.subr.mxu0 %v337_v48  ;;  %v322_v47 = vld [vmem:[#allocation3] sm:$0xff] }
  0x6a   : > { %v333_v52 = vld [vmem:[%s2067_s9 + $0x48] sm:$0xff]  ;;  %975 = vmatprep.subr.mxu1 %v465_v49  ;;  %v332_v54 = vld [vmem:[%s2067_s9 + $0x40] sm:$0xff]  ;;  %905 = vmatpush1.msra.mxu0 %v336_v50 }
  0x6b   : > { %v461_v53 = vld [vmem:[%s2067_s9 + $0x448] sm:$0xff]  ;;  %v460_v55 = vld [vmem:[%s2067_s9 + $0x440] sm:$0xff]  ;;  %976 = vmatpush1.msra.mxu1 %v464_v51  ;;  %906 = vmatprep.subr.mxu0 %v333_v52  ;;  %v2186_v52 = vsub.s32 %v306_v42, %v2175_v41 }
  0x6c   : > { %v329_v56 = vld [vmem:[%s2067_s9 + $0x28] sm:$0xff]  ;;  %977 = vmatprep.subr.mxu1 %v461_v53  ;;  %v328_v58 = vld [vmem:[%s2067_s9 + $0x20] sm:$0xff]  ;;  %907 = vmatpush1.msra.mxu0 %v332_v54 }
  0x6d   : > { %v457_v57 = vld [vmem:[%s2067_s9 + $0x428] sm:$0xff]  ;;  %v456_v59 = vld [vmem:[%s2067_s9 + $0x420] sm:$0xff]  ;;  %978 = vmatpush1.msra.mxu1 %v460_v55  ;;  %908 = vmatprep.subr.mxu0 %v329_v56  ;;  %v838_v55 = vcombine.high %v322_v47, %v322_v47 }
  0x6e   : > { %v325_v60 = vld [vmem:[%s2067_s9 + $0x8] sm:$0xff]  ;;  %979 = vmatprep.subr.mxu1 %v457_v57  ;;  %v324_v62 = vld [vmem:[%s2067_s9] sm:$0xff]  ;;  %909 = vmatpush1.msra.mxu0 %v328_v58 }
  0x6f   : > { %v453_v61 = vld [vmem:[%s2067_s9 + $0x408] sm:$0xff]  ;;  %v452_v63 = vld [vmem:[%s2067_s9 + $0x400] sm:$0xff]  ;;  %980 = vmatpush1.msra.mxu1 %v456_v59  ;;  %910 = vmatprep.subr.mxu0 %v325_v60 }
  0x70   : > { %v449_v0 = vld [vmem:[%s2067_s9 + $0x3e8] sm:$0xff]  ;;  %981 = vmatprep.subr.mxu1 %v453_v61  ;;  %v448_v2 = vld [vmem:[%s2067_s9 + $0x3e0] sm:$0xff]  ;;  %911 = vmatpush1.msra.mxu0 %v324_v62  ;;  %v2197_v62 = vrot.slane %v322_v47, %v2186_v52 }
  0x71   : > { %v577_v1 = vld [vmem:[%s2067_s9 + $0x7e8] sm:$0xff]  ;;  %v576_v3 = vld [vmem:[%s2067_s9 + $0x7e0] sm:$0xff]  ;;  %982 = vmatpush1.msra.mxu1 %v452_v63  ;;  %912 = vmatprep.subr.mxu0 %v449_v0 }
  0x72   : > { %v445_v4 = vld [vmem:[%s2067_s9 + $0x3c8] sm:$0xff]  ;;  %983 = vmatprep.subr.mxu1 %v577_v1  ;;  %v444_v6 = vld [vmem:[%s2067_s9 + $0x3c0] sm:$0xff]  ;;  %913 = vmatpush2.msra.mxu0 %v448_v2  ;;  %v2202_v1 = vrot.slane %v838_v55, %v2186_v52 }
  0x73   : > { %v573_v5 = vld [vmem:[%s2067_s9 + $0x7c8] sm:$0xff]  ;;  %v572_v7 = vld [vmem:[%s2067_s9 + $0x7c0] sm:$0xff]  ;;  %984 = vmatpush2.msra.mxu1 %v576_v3  ;;  %914 = vmatprep.subr.mxu0 %v445_v4 }
  0x74   : > { %v441_v8 = vld [vmem:[%s2067_s9 + $0x3a8] sm:$0xff]  ;;  %985 = vmatprep.subr.mxu1 %v573_v5  ;;  %v440_v10 = vld [vmem:[%s2067_s9 + $0x3a0] sm:$0xff]  ;;  %915 = vmatpush2.msra.mxu0 %v444_v6 }
  0x75   : > { %v569_v9 = vld [vmem:[%s2067_s9 + $0x7a8] sm:$0xff]  ;;  %v568_v11 = vld [vmem:[%s2067_s9 + $0x7a0] sm:$0xff]  ;;  %986 = vmatpush2.msra.mxu1 %v572_v7  ;;  %916 = vmatprep.subr.mxu0 %v441_v8  ;;  %v2212_v8 = vcombine.high %v2197_v62, %v2197_v62 }
  0x76   : > { %v437_v12 = vld [vmem:[%s2067_s9 + $0x388] sm:$0xff]  ;;  %987 = vmatprep.subr.mxu1 %v569_v9  ;;  %v436_v14 = vld [vmem:[%s2067_s9 + $0x380] sm:$0xff]  ;;  %917 = vmatpush2.msra.mxu0 %v440_v10  ;;  %v2217_v10 = vcombine.high %v2202_v1, %v2202_v1 }
  0x77   : > { %v565_v13 = vld [vmem:[%s2067_s9 + $0x788] sm:$0xff]  ;;  %v564_v15 = vld [vmem:[%s2067_s9 + $0x780] sm:$0xff]  ;;  %988 = vmatpush2.msra.mxu1 %v568_v11  ;;  %918 = vmatprep.subr.mxu0 %v437_v12 }
  0x78   : > { %v433_v16 = vld [vmem:[%s2067_s9 + $0x368] sm:$0xff]  ;;  %989 = vmatprep.subr.mxu1 %v565_v13  ;;  %v432_v18 = vld [vmem:[%s2067_s9 + $0x360] sm:$0xff]  ;;  %919 = vmatpush2.msra.mxu0 %v436_v14 }
  0x79   : > { %v561_v17 = vld [vmem:[%s2067_s9 + $0x768] sm:$0xff]  ;;  %v560_v19 = vld [vmem:[%s2067_s9 + $0x760] sm:$0xff]  ;;  %990 = vmatpush2.msra.mxu1 %v564_v15  ;;  %920 = vmatprep.subr.mxu0 %v433_v16 }
  0x7a   : > { %v429_v20 = vld [vmem:[%s2067_s9 + $0x348] sm:$0xff]  ;;  %991 = vmatprep.subr.mxu1 %v561_v17  ;;  %v428_v22 = vld [vmem:[%s2067_s9 + $0x340] sm:$0xff]  ;;  %921 = vmatpush2.msra.mxu0 %v432_v18 }
  0x7b   : > { %v557_v21 = vld [vmem:[%s2067_s9 + $0x748] sm:$0xff]  ;;  %v556_v23 = vld [vmem:[%s2067_s9 + $0x740] sm:$0xff]  ;;  %992 = vmatpush2.msra.mxu1 %v560_v19  ;;  %922 = vmatprep.subr.mxu0 %v429_v20 }
  0x7c   : > { %v425_v24 = vld [vmem:[%s2067_s9 + $0x328] sm:$0xff]  ;;  %993 = vmatprep.subr.mxu1 %v557_v21  ;;  %v424_v26 = vld [vmem:[%s2067_s9 + $0x320] sm:$0xff]  ;;  %923 = vmatpush2.msra.mxu0 %v428_v22 }
  0x7d   : > { %v553_v25 = vld [vmem:[%s2067_s9 + $0x728] sm:$0xff]  ;;  %v552_v27 = vld [vmem:[%s2067_s9 + $0x720] sm:$0xff]  ;;  %994 = vmatpush2.msra.mxu1 %v556_v23  ;;  %924 = vmatprep.subr.mxu0 %v425_v24 }
  0x7e   : > { %v421_v28 = vld [vmem:[%s2067_s9 + $0x308] sm:$0xff]  ;;  %995 = vmatprep.subr.mxu1 %v553_v25  ;;  %v420_v33 = vld [vmem:[%s2067_s9 + $0x300] sm:$0xff]  ;;  %925 = vmatpush2.msra.mxu0 %v424_v26 }
  0x7f   : > { %v549_v29 = vld [vmem:[%s2067_s9 + $0x708] sm:$0xff]  ;;  %v548_v34 = vld [vmem:[%s2067_s9 + $0x700] sm:$0xff]  ;;  %996 = vmatpush2.msra.mxu1 %v552_v27  ;;  %926 = vmatprep.subr.mxu0 %v421_v28 }
  0x80   : > { %v417_v35 = vld [vmem:[%s2067_s9 + $0x2e8] sm:$0xff]  ;;  %997 = vmatprep.subr.mxu1 %v549_v29  ;;  %v416_v37 = vld [vmem:[%s2067_s9 + $0x2e0] sm:$0xff]  ;;  %927 = vmatpush2.msra.mxu0 %v420_v33 }
  0x81   : > { %v545_v36 = vld [vmem:[%s2067_s9 + $0x6e8] sm:$0xff]  ;;  %v544_v38 = vld [vmem:[%s2067_s9 + $0x6e0] sm:$0xff]  ;;  %998 = vmatpush2.msra.mxu1 %v548_v34  ;;  %928 = vmatprep.subr.mxu0 %v417_v35 }
  0x82   : > { %v413_v39 = vld [vmem:[%s2067_s9 + $0x2c8] sm:$0xff]  ;;  %999 = vmatprep.subr.mxu1 %v545_v36  ;;  %v412_v43 = vld [vmem:[%s2067_s9 + $0x2c0] sm:$0xff]  ;;  %929 = vmatpush2.msra.mxu0 %v416_v37 }
  0x83   : > { %v541_v40 = vld [vmem:[%s2067_s9 + $0x6c8] sm:$0xff]  ;;  %v540_v44 = vld [vmem:[%s2067_s9 + $0x6c0] sm:$0xff]  ;;  %1000 = vmatpush2.msra.mxu1 %v544_v38  ;;  %930 = vmatprep.subr.mxu0 %v413_v39 }
  0x84   : > { %v409_v45 = vld [vmem:[%s2067_s9 + $0x2a8] sm:$0xff]  ;;  %1001 = vmatprep.subr.mxu1 %v541_v40  ;;  %v408_v48 = vld [vmem:[%s2067_s9 + $0x2a0] sm:$0xff]  ;;  %931 = vmatpush2.msra.mxu0 %v412_v43 }
  0x85   : > { %v537_v46 = vld [vmem:[%s2067_s9 + $0x6a8] sm:$0xff]  ;;  %v536_v49 = vld [vmem:[%s2067_s9 + $0x6a0] sm:$0xff]  ;;  %1002 = vmatpush2.msra.mxu1 %v540_v44  ;;  %932 = vmatprep.subr.mxu0 %v409_v45 }
  0x86   : > { %v405_v50 = vld [vmem:[%s2067_s9 + $0x288] sm:$0xff]  ;;  %1003 = vmatprep.subr.mxu1 %v537_v46  ;;  %v404_v53 = vld [vmem:[%s2067_s9 + $0x280] sm:$0xff]  ;;  %933 = vmatpush2.msra.mxu0 %v408_v48 }
  0x87   : > { %v533_v51 = vld [vmem:[%s2067_s9 + $0x688] sm:$0xff]  ;;  %v532_v54 = vld [vmem:[%s2067_s9 + $0x680] sm:$0xff]  ;;  %1004 = vmatpush2.msra.mxu1 %v536_v49  ;;  %934 = vmatprep.subr.mxu0 %v405_v50 }
  0x88   : > { %v401_v56 = vld [vmem:[%s2067_s9 + $0x268] sm:$0xff]  ;;  %1005 = vmatprep.subr.mxu1 %v533_v51  ;;  %v400_v58 = vld [vmem:[%s2067_s9 + $0x260] sm:$0xff]  ;;  %935 = vmatpush2.msra.mxu0 %v404_v53 }
  0x89   : > { %v529_v57 = vld [vmem:[%s2067_s9 + $0x668] sm:$0xff]  ;;  %v528_v59 = vld [vmem:[%s2067_s9 + $0x660] sm:$0xff]  ;;  %1006 = vmatpush2.msra.mxu1 %v532_v54  ;;  %936 = vmatprep.subr.mxu0 %v401_v56 }
  0x8a   : > { %v397_v60 = vld [vmem:[%s2067_s9 + $0x248] sm:$0xff]  ;;  %1007 = vmatprep.subr.mxu1 %v529_v57  ;;  %v396_v63 = vld [vmem:[%s2067_s9 + $0x240] sm:$0xff]  ;;  %937 = vmatpush2.msra.mxu0 %v400_v58 }
  0x8b   : > { %v525_v61 = vld [vmem:[%s2067_s9 + $0x648] sm:$0xff]  ;;  %v524_v0 = vld [vmem:[%s2067_s9 + $0x640] sm:$0xff]  ;;  %1008 = vmatpush2.msra.mxu1 %v528_v59  ;;  %938 = vmatprep.subr.mxu0 %v397_v60 }
  0x8c   : > { %v393_v2 = vld [vmem:[%s2067_s9 + $0x228] sm:$0xff]  ;;  %1009 = vmatprep.subr.mxu1 %v525_v61  ;;  %v392_v4 = vld [vmem:[%s2067_s9 + $0x220] sm:$0xff]  ;;  %939 = vmatpush2.msra.mxu0 %v396_v63 }
  0x8d   : > { %v521_v3 = vld [vmem:[%s2067_s9 + $0x628] sm:$0xff]  ;;  %v520_v5 = vld [vmem:[%s2067_s9 + $0x620] sm:$0xff]  ;;  %1010 = vmatpush2.msra.mxu1 %v524_v0  ;;  %940 = vmatprep.subr.mxu0 %v393_v2 }
  0x8e   : > { %v389_v6 = vld [vmem:[%s2067_s9 + $0x208] sm:$0xff]  ;;  %1011 = vmatprep.subr.mxu1 %v521_v3  ;;  %v388_v9 = vld [vmem:[%s2067_s9 + $0x200] sm:$0xff]  ;;  %941 = vmatpush2.msra.mxu0 %v392_v4 }
  0x8f   : > { %v517_v7 = vld [vmem:[%s2067_s9 + $0x608] sm:$0xff]  ;;  %1012 = vmatpush2.msra.mxu1 %v520_v5  ;;  %v516_v11 = vld [vmem:[%s2067_s9 + $0x600] sm:$0xff]  ;;  %942 = vmatprep.subr.mxu0 %v389_v6 }
  0x90   : > { %1013 = vmatprep.subr.mxu1 %v517_v7  ;;  %943 = vmatpush2.msra.mxu0 %v388_v9  ;;  %v641_v12 = vld [vmem:[%s2067_s9 + $0x9e8] sm:$0xff]  ;;  %v640_v14 = vld [vmem:[%s2067_s9 + $0x9e0] sm:$0xff] }
  0x91   : > { %944 = vmatprep.mubr.f32.mxu0 %v2212_v8  ;;  %v769_v13 = vld [vmem:[%s2067_s9 + $0xde8] sm:$0xff]  ;;  %1014 = vmatpush2.msra.mxu1 %v516_v11  ;;  %v768_v15 = vld [vmem:[%s2067_s9 + $0xde0] sm:$0xff] }
  0x92   : > { %1015 = vmatprep.mubr.f32.mxu1 %v2217_v10  ;;  %945 = vmatmul.mubr.f32.vlgmr.msra.gmra.mxu0 %v2197_v62  ;;  %v637_v16 = vld [vmem:[%s2067_s9 + $0x9c8] sm:$0xff]  ;;  %v636_v18 = vld [vmem:[%s2067_s9 + $0x9c0] sm:$0xff] }
  0x93   : > { %1016 = vmatmul.mubr.f32.vlgmr.msra.gmra.mxu1 %v2202_v1  ;;  %v765_v17 = vld [vmem:[%s2067_s9 + $0xdc8] sm:$0xff]  ;;  %1022 = vmatprep.subr.mxu0 %v641_v12  ;;  %v764_v19 = vld [vmem:[%s2067_s9 + $0xdc0] sm:$0xff] }
  0x94   : > { %1093 = vmatprep.subr.mxu1 %v769_v13  ;;  %1023 = vmatpush1.msra.mxu0 %v640_v14  ;;  %v633_v20 = vld [vmem:[%s2067_s9 + $0x9a8] sm:$0xff]  ;;  %v632_v22 = vld [vmem:[%s2067_s9 + $0x9a0] sm:$0xff] }
  0x95   : > { %1094 = vmatpush1.msra.mxu1 %v768_v15  ;;  %v761_v21 = vld [vmem:[%s2067_s9 + $0xda8] sm:$0xff]  ;;  %1024 = vmatprep.subr.mxu0 %v637_v16  ;;  %v760_v23 = vld [vmem:[%s2067_s9 + $0xda0] sm:$0xff] }
  0x96   : > { %1095 = vmatprep.subr.mxu1 %v765_v17  ;;  %1025 = vmatpush1.msra.mxu0 %v636_v18  ;;  %v629_v24 = vld [vmem:[%s2067_s9 + $0x988] sm:$0xff]  ;;  %v628_v26 = vld [vmem:[%s2067_s9 + $0x980] sm:$0xff] }
  0x97   : > { %1096 = vmatpush1.msra.mxu1 %v764_v19  ;;  %v757_v25 = vld [vmem:[%s2067_s9 + $0xd88] sm:$0xff]  ;;  %1026 = vmatprep.subr.mxu0 %v633_v20  ;;  %v756_v27 = vld [vmem:[%s2067_s9 + $0xd80] sm:$0xff] }
  0x98   : > { %1097 = vmatprep.subr.mxu1 %v761_v21  ;;  %1027 = vmatpush1.msra.mxu0 %v632_v22  ;;  %v625_v28 = vld [vmem:[%s2067_s9 + $0x968] sm:$0xff]  ;;  %v624_v30 = vld [vmem:[%s2067_s9 + $0x960] sm:$0xff] }
  0x99   : > { %1098 = vmatpush1.msra.mxu1 %v760_v23  ;;  %v753_v29 = vld [vmem:[%s2067_s9 + $0xd68] sm:$0xff]  ;;  %1028 = vmatprep.subr.mxu0 %v629_v24  ;;  %v752_v31 = vld [vmem:[%s2067_s9 + $0xd60] sm:$0xff] }
  0x9a   : > { %1099 = vmatprep.subr.mxu1 %v757_v25  ;;  %1029 = vmatpush1.msra.mxu0 %v628_v26  ;;  %v621_v32 = vld [vmem:[%s2067_s9 + $0x948] sm:$0xff]  ;;  %v620_v34 = vld [vmem:[%s2067_s9 + $0x940] sm:$0xff] }
  0x9b   : > { %1100 = vmatpush1.msra.mxu1 %v756_v27  ;;  %v749_v33 = vld [vmem:[%s2067_s9 + $0xd48] sm:$0xff]  ;;  %1030 = vmatprep.subr.mxu0 %v625_v28  ;;  %v748_v35 = vld [vmem:[%s2067_s9 + $0xd40] sm:$0xff] }
  0x9c   : > { %1101 = vmatprep.subr.mxu1 %v753_v29  ;;  %1031 = vmatpush1.msra.mxu0 %v624_v30  ;;  %v617_v36 = vld [vmem:[%s2067_s9 + $0x928] sm:$0xff]  ;;  %v616_v38 = vld [vmem:[%s2067_s9 + $0x920] sm:$0xff] }
  0x9d   : > { %1102 = vmatpush1.msra.mxu1 %v752_v31  ;;  %v745_v37 = vld [vmem:[%s2067_s9 + $0xd28] sm:$0xff]  ;;  %1032 = vmatprep.subr.mxu0 %v621_v32  ;;  %v744_v39 = vld [vmem:[%s2067_s9 + $0xd20] sm:$0xff] }
  0x9e   : > { %1103 = vmatprep.subr.mxu1 %v749_v33  ;;  %1033 = vmatpush1.msra.mxu0 %v620_v34  ;;  %v613_v40 = vld [vmem:[%s2067_s9 + $0x908] sm:$0xff]  ;;  %v612_v43 = vld [vmem:[%s2067_s9 + $0x900] sm:$0xff] }
  0x9f   : > { %1104 = vmatpush1.msra.mxu1 %v748_v35  ;;  %v741_v42 = vld [vmem:[%s2067_s9 + $0xd08] sm:$0xff]  ;;  %1034 = vmatprep.subr.mxu0 %v617_v36  ;;  %v740_v44 = vld [vmem:[%s2067_s9 + $0xd00] sm:$0xff] }
  0xa0   : > { %1105 = vmatprep.subr.mxu1 %v745_v37  ;;  %1035 = vmatpush1.msra.mxu0 %v616_v38  ;;  %v609_v45 = vld [vmem:[%s2067_s9 + $0x8e8] sm:$0xff]  ;;  %v608_v47 = vld [vmem:[%s2067_s9 + $0x8e0] sm:$0xff] }
  0xa1   : > { %1106 = vmatpush1.msra.mxu1 %v744_v39  ;;  %v737_v46 = vld [vmem:[%s2067_s9 + $0xce8] sm:$0xff]  ;;  %1036 = vmatprep.subr.mxu0 %v613_v40  ;;  %v736_v48 = vld [vmem:[%s2067_s9 + $0xce0] sm:$0xff] }
  0xa2   : > { %1107 = vmatprep.subr.mxu1 %v741_v42  ;;  %1037 = vmatpush1.msra.mxu0 %v612_v43  ;;  %v605_v49 = vld [vmem:[%s2067_s9 + $0x8c8] sm:$0xff]  ;;  %v604_v51 = vld [vmem:[%s2067_s9 + $0x8c0] sm:$0xff] }
  0xa3   : > { %1108 = vmatpush1.msra.mxu1 %v740_v44  ;;  %v733_v50 = vld [vmem:[%s2067_s9 + $0xcc8] sm:$0xff]  ;;  %1038 = vmatprep.subr.mxu0 %v609_v45  ;;  %v732_v53 = vld [vmem:[%s2067_s9 + $0xcc0] sm:$0xff] }
  0xa4   : > { %1109 = vmatprep.subr.mxu1 %v737_v46  ;;  %1039 = vmatpush1.msra.mxu0 %v608_v47  ;;  %v601_v54 = vld [vmem:[%s2067_s9 + $0x8a8] sm:$0xff]  ;;  %v600_v56 = vld [vmem:[%s2067_s9 + $0x8a0] sm:$0xff] }
  0xa5   : > { %1110 = vmatpush1.msra.mxu1 %v736_v48  ;;  %v729_v55 = vld [vmem:[%s2067_s9 + $0xca8] sm:$0xff]  ;;  %1040 = vmatprep.subr.mxu0 %v605_v49  ;;  %v728_v57 = vld [vmem:[%s2067_s9 + $0xca0] sm:$0xff] }
  0xa6   : > { %1111 = vmatprep.subr.mxu1 %v733_v50  ;;  %1041 = vmatpush1.msra.mxu0 %v604_v51  ;;  %v597_v58 = vld [vmem:[%s2067_s9 + $0x888] sm:$0xff]  ;;  %v596_v60 = vld [vmem:[%s2067_s9 + $0x880] sm:$0xff] }
  0xa7   : > { %1112 = vmatpush1.msra.mxu1 %v732_v53  ;;  %v725_v59 = vld [vmem:[%s2067_s9 + $0xc88] sm:$0xff]  ;;  %1042 = vmatprep.subr.mxu0 %v601_v54  ;;  %v724_v61 = vld [vmem:[%s2067_s9 + $0xc80] sm:$0xff] }
  0xa8   : > { %1113 = vmatprep.subr.mxu1 %v729_v55  ;;  %1043 = vmatpush1.msra.mxu0 %v600_v56  ;;  %v593_v63 = vld [vmem:[%s2067_s9 + $0x868] sm:$0xff]  ;;  %v592_v2 = vld [vmem:[%s2067_s9 + $0x860] sm:$0xff] }
  0xa9   : > { %1114 = vmatpush1.msra.mxu1 %v728_v57  ;;  %v721_v0 = vld [vmem:[%s2067_s9 + $0xc68] sm:$0xff]  ;;  %1044 = vmatprep.subr.mxu0 %v597_v58  ;;  %v720_v3 = vld [vmem:[%s2067_s9 + $0xc60] sm:$0xff] }
  0xaa   : > { %1115 = vmatprep.subr.mxu1 %v725_v59  ;;  %1045 = vmatpush1.msra.mxu0 %v596_v60  ;;  %v589_v4 = vld [vmem:[%s2067_s9 + $0x848] sm:$0xff]  ;;  %v588_v6 = vld [vmem:[%s2067_s9 + $0x840] sm:$0xff] }
  0xab   : > { %1116 = vmatpush1.msra.mxu1 %v724_v61  ;;  %v717_v5 = vld [vmem:[%s2067_s9 + $0xc48] sm:$0xff]  ;;  %1046 = vmatprep.subr.mxu0 %v593_v63  ;;  %v716_v7 = vld [vmem:[%s2067_s9 + $0xc40] sm:$0xff] }
  0xac   : > { %1117 = vmatprep.subr.mxu1 %v721_v0  ;;  %1047 = vmatpush1.msra.mxu0 %v592_v2  ;;  %v585_v9 = vld [vmem:[%s2067_s9 + $0x828] sm:$0xff]  ;;  %v584_v12 = vld [vmem:[%s2067_s9 + $0x820] sm:$0xff]  ;;  %v323_v2 = vld [vmem:[#allocation3 + $0x8] sm:$0xff] }
  0xad   : > { %1118 = vmatpush1.msra.mxu1 %v720_v3  ;;  %v713_v11 = vld [vmem:[%s2067_s9 + $0xc28] sm:$0xff]  ;;  %1048 = vmatprep.subr.mxu0 %v589_v4  ;;  %v712_v13 = vld [vmem:[%s2067_s9 + $0xc20] sm:$0xff] }
  0xae   : > { %1119 = vmatprep.subr.mxu1 %v717_v5  ;;  %1049 = vmatpush1.msra.mxu0 %v588_v6  ;;  %v581_v14 = vld [vmem:[%s2067_s9 + $0x808] sm:$0xff]  ;;  %v580_v16 = vld [vmem:[%s2067_s9 + $0x800] sm:$0xff] }
  0xaf   : > { %1120 = vmatpush1.msra.mxu1 %v716_v7  ;;  %v709_v15 = vld [vmem:[%s2067_s9 + $0xc08] sm:$0xff]  ;;  %1050 = vmatprep.subr.mxu0 %v585_v9  ;;  %v708_v17 = vld [vmem:[%s2067_s9 + $0xc00] sm:$0xff] }
  0xb0   : > { %1121 = vmatprep.subr.mxu1 %v713_v11  ;;  %1051 = vmatpush1.msra.mxu0 %v584_v12  ;;  %v705_v18 = vld [vmem:[%s2067_s9 + $0xbe8] sm:$0xff]  ;;  %v704_v20 = vld [vmem:[%s2067_s9 + $0xbe0] sm:$0xff]  ;;  %v855_v11 = vcombine.high %v323_v2, %v323_v2 }
  0xb1   : > { %1122 = vmatpush1.msra.mxu1 %v712_v13  ;;  %v833_v19 = vld [vmem:[%s2067_s9 + $0xfe8] sm:$0xff]  ;;  %1052 = vmatprep.subr.mxu0 %v581_v14  ;;  %v832_v21 = vld [vmem:[%s2067_s9 + $0xfe0] sm:$0xff] }
  0xb2   : > { %1123 = vmatprep.subr.mxu1 %v709_v15  ;;  %1053 = vmatpush1.msra.mxu0 %v580_v16  ;;  %v701_v22 = vld [vmem:[%s2067_s9 + $0xbc8] sm:$0xff]  ;;  %v700_v24 = vld [vmem:[%s2067_s9 + $0xbc0] sm:$0xff]  ;;  %v2343_v16 = vrot.slane %v323_v2, %v2186_v52  ;;  %v355_v2 = vld [vmem:[%s2067_s9 + $0xf8] sm:$0xff] }
  0xb3   : > { %1124 = vmatpush1.msra.mxu1 %v708_v17  ;;  %v829_v23 = vld [vmem:[%s2067_s9 + $0xfc8] sm:$0xff]  ;;  %1054 = vmatprep.subr.mxu0 %v705_v18  ;;  %v828_v25 = vld [vmem:[%s2067_s9 + $0xfc0] sm:$0xff] }
  0xb4   : > { %1125 = vmatprep.subr.mxu1 %v833_v19  ;;  %1055 = vmatpush2.msra.mxu0 %v704_v20  ;;  %v697_v26 = vld [vmem:[%s2067_s9 + $0xba8] sm:$0xff]  ;;  %v696_v28 = vld [vmem:[%s2067_s9 + $0xba0] sm:$0xff] }
  0xb5   : > { %1126 = vmatpush2.msra.mxu1 %v832_v21  ;;  %v825_v27 = vld [vmem:[%s2067_s9 + $0xfa8] sm:$0xff]  ;;  %1056 = vmatprep.subr.mxu0 %v701_v22  ;;  %v824_v29 = vld [vmem:[%s2067_s9 + $0xfa0] sm:$0xff]  ;;  %v2350_v21 = vrot.slane %v855_v11, %v2186_v52  ;;  %v478_v11 = vld [vmem:[%s2067_s9 + $0x4d0] sm:$0xff] }
  0xb6   : > { %1127 = vmatprep.subr.mxu1 %v829_v23  ;;  %1057 = vmatpush2.msra.mxu0 %v700_v24  ;;  %v693_v30 = vld [vmem:[%s2067_s9 + $0xb88] sm:$0xff]  ;;  %v692_v32 = vld [vmem:[%s2067_s9 + $0xb80] sm:$0xff] }
  0xb7   : > { %1128 = vmatpush2.msra.mxu1 %v828_v25  ;;  %v821_v31 = vld [vmem:[%s2067_s9 + $0xf88] sm:$0xff]  ;;  %1058 = vmatprep.subr.mxu0 %v697_v26  ;;  %v820_v33 = vld [vmem:[%s2067_s9 + $0xf80] sm:$0xff]  ;;  %v2358_v26 = vcombine.high %v2343_v16, %v2343_v16 }
  0xb8   : > { %1129 = vmatprep.subr.mxu1 %v825_v27  ;;  %1059 = vmatpush2.msra.mxu0 %v696_v28  ;;  %v689_v34 = vld [vmem:[%s2067_s9 + $0xb68] sm:$0xff]  ;;  %v688_v36 = vld [vmem:[%s2067_s9 + $0xb60] sm:$0xff] }
  0xb9   : > { %1130 = vmatpush2.msra.mxu1 %v824_v29  ;;  %v817_v35 = vld [vmem:[%s2067_s9 + $0xf68] sm:$0xff]  ;;  %1060 = vmatprep.subr.mxu0 %v693_v30  ;;  %v816_v37 = vld [vmem:[%s2067_s9 + $0xf60] sm:$0xff]  ;;  %v2364_v29 = vcombine.high %v2350_v21, %v2350_v21  ;;  %v387_v30 = vld [vmem:[%s2067_s9 + $0x1f8] sm:$0xff] }
  0xba   : > { %1131 = vmatprep.subr.mxu1 %v821_v31  ;;  %1061 = vmatpush2.msra.mxu0 %v692_v32  ;;  %v685_v38 = vld [vmem:[%s2067_s9 + $0xb48] sm:$0xff]  ;;  %v684_v40 = vld [vmem:[%s2067_s9 + $0xb40] sm:$0xff]  ;;  %v515_v31 = vld [vmem:[%s2067_s9 + $0x5f8] sm:$0xff] }
  0xbb   : > { %1132 = vmatpush2.msra.mxu1 %v820_v33  ;;  %v813_v39 = vld [vmem:[%s2067_s9 + $0xf48] sm:$0xff]  ;;  %1062 = vmatprep.subr.mxu0 %v689_v34  ;;  %v812_v42 = vld [vmem:[%s2067_s9 + $0xf40] sm:$0xff]  ;;  %v386_v32 = vld [vmem:[%s2067_s9 + $0x1f0] sm:$0xff] }
  0xbc   : > { %1133 = vmatprep.subr.mxu1 %v817_v35  ;;  %1063 = vmatpush2.msra.mxu0 %v688_v36  ;;  %v681_v43 = vld [vmem:[%s2067_s9 + $0xb28] sm:$0xff]  ;;  %v680_v45 = vld [vmem:[%s2067_s9 + $0xb20] sm:$0xff]  ;;  %v514_v33 = vld [vmem:[%s2067_s9 + $0x5f0] sm:$0xff] }
  0xbd   : > { %1134 = vmatpush2.msra.mxu1 %v816_v37  ;;  %v809_v44 = vld [vmem:[%s2067_s9 + $0xf28] sm:$0xff]  ;;  %1064 = vmatprep.subr.mxu0 %v685_v38  ;;  %v808_v46 = vld [vmem:[%s2067_s9 + $0xf20] sm:$0xff]  ;;  %v383_v34 = vld [vmem:[%s2067_s9 + $0x1d8] sm:$0xff] }
  0xbe   : > { %1135 = vmatprep.subr.mxu1 %v813_v39  ;;  %1065 = vmatpush2.msra.mxu0 %v684_v40  ;;  %v677_v47 = vld [vmem:[%s2067_s9 + $0xb08] sm:$0xff]  ;;  %v676_v49 = vld [vmem:[%s2067_s9 + $0xb00] sm:$0xff]  ;;  %v511_v35 = vld [vmem:[%s2067_s9 + $0x5d8] sm:$0xff] }
  0xbf   : > { %1136 = vmatpush2.msra.mxu1 %v812_v42  ;;  %v805_v48 = vld [vmem:[%s2067_s9 + $0xf08] sm:$0xff]  ;;  %1066 = vmatprep.subr.mxu0 %v681_v43  ;;  %v804_v50 = vld [vmem:[%s2067_s9 + $0xf00] sm:$0xff]  ;;  %v382_v36 = vld [vmem:[%s2067_s9 + $0x1d0] sm:$0xff] }
  0xc0   : > { %1137 = vmatprep.subr.mxu1 %v809_v44  ;;  %1067 = vmatpush2.msra.mxu0 %v680_v45  ;;  %v673_v51 = vld [vmem:[%s2067_s9 + $0xae8] sm:$0xff]  ;;  %v672_v54 = vld [vmem:[%s2067_s9 + $0xae0] sm:$0xff]  ;;  %v510_v37 = vld [vmem:[%s2067_s9 + $0x5d0] sm:$0xff] }
  0xc1   : > { %1138 = vmatpush2.msra.mxu1 %v808_v46  ;;  %v801_v53 = vld [vmem:[%s2067_s9 + $0xee8] sm:$0xff]  ;;  %1068 = vmatprep.subr.mxu0 %v677_v47  ;;  %v800_v55 = vld [vmem:[%s2067_s9 + $0xee0] sm:$0xff]  ;;  %v379_v38 = vld [vmem:[%s2067_s9 + $0x1b8] sm:$0xff] }
  0xc2   : > { %1139 = vmatprep.subr.mxu1 %v805_v48  ;;  %1069 = vmatpush2.msra.mxu0 %v676_v49  ;;  %v669_v56 = vld [vmem:[%s2067_s9 + $0xac8] sm:$0xff]  ;;  %v668_v58 = vld [vmem:[%s2067_s9 + $0xac0] sm:$0xff]  ;;  %v507_v39 = vld [vmem:[%s2067_s9 + $0x5b8] sm:$0xff] }
  0xc3   : > { %1140 = vmatpush2.msra.mxu1 %v804_v50  ;;  %v797_v57 = vld [vmem:[%s2067_s9 + $0xec8] sm:$0xff]  ;;  %1070 = vmatprep.subr.mxu0 %v673_v51  ;;  %v796_v59 = vld [vmem:[%s2067_s9 + $0xec0] sm:$0xff]  ;;  %v378_v40 = vld [vmem:[%s2067_s9 + $0x1b0] sm:$0xff] }
  0xc4   : > { %1141 = vmatprep.subr.mxu1 %v801_v53  ;;  %1071 = vmatpush2.msra.mxu0 %v672_v54  ;;  %v665_v60 = vld [vmem:[%s2067_s9 + $0xaa8] sm:$0xff]  ;;  %v664_v63 = vld [vmem:[%s2067_s9 + $0xaa0] sm:$0xff]  ;;  %v506_v42 = vld [vmem:[%s2067_s9 + $0x5b0] sm:$0xff] }
  0xc5   : > { %1142 = vmatpush2.msra.mxu1 %v800_v55  ;;  %v793_v61 = vld [vmem:[%s2067_s9 + $0xea8] sm:$0xff]  ;;  %1072 = vmatprep.subr.mxu0 %v669_v56  ;;  %v792_v0 = vld [vmem:[%s2067_s9 + $0xea0] sm:$0xff]  ;;  %v375_v43 = vld [vmem:[%s2067_s9 + $0x198] sm:$0xff] }
  0xc6   : > { %1143 = vmatprep.subr.mxu1 %v797_v57  ;;  %1073 = vmatpush2.msra.mxu0 %v668_v58  ;;  %v661_v3 = vld [vmem:[%s2067_s9 + $0xa88] sm:$0xff]  ;;  %v660_v5 = vld [vmem:[%s2067_s9 + $0xa80] sm:$0xff]  ;;  %v503_v44 = vld [vmem:[%s2067_s9 + $0x598] sm:$0xff] }
  0xc7   : > { %1144 = vmatpush2.msra.mxu1 %v796_v59  ;;  %v789_v4 = vld [vmem:[%s2067_s9 + $0xe88] sm:$0xff]  ;;  %1074 = vmatprep.subr.mxu0 %v665_v60  ;;  %v788_v6 = vld [vmem:[%s2067_s9 + $0xe80] sm:$0xff]  ;;  %v374_v45 = vld [vmem:[%s2067_s9 + $0x190] sm:$0xff] }
  0xc8   : > { %1145 = vmatprep.subr.mxu1 %v793_v61  ;;  %1075 = vmatpush2.msra.mxu0 %v664_v63  ;;  %v657_v7 = vld [vmem:[%s2067_s9 + $0xa68] sm:$0xff]  ;;  %v656_v12 = vld [vmem:[%s2067_s9 + $0xa60] sm:$0xff]  ;;  %v502_v46 = vld [vmem:[%s2067_s9 + $0x590] sm:$0xff] }
  0xc9   : > { %1146 = vmatpush2.msra.mxu1 %v792_v0  ;;  %v785_v9 = vld [vmem:[%s2067_s9 + $0xe68] sm:$0xff]  ;;  %1076 = vmatprep.subr.mxu0 %v661_v3  ;;  %v784_v13 = vld [vmem:[%s2067_s9 + $0xe60] sm:$0xff]  ;;  %v371_v47 = vld [vmem:[%s2067_s9 + $0x178] sm:$0xff] }
  0xca   : > { %1147 = vmatprep.subr.mxu1 %v789_v4  ;;  %1077 = vmatpush2.msra.mxu0 %v660_v5  ;;  %v653_v14 = vld [vmem:[%s2067_s9 + $0xa48] sm:$0xff]  ;;  %v652_v17 = vld [vmem:[%s2067_s9 + $0xa40] sm:$0xff]  ;;  %v499_v48 = vld [vmem:[%s2067_s9 + $0x578] sm:$0xff] }
  0xcb   : > { %1148 = vmatpush2.msra.mxu1 %v788_v6  ;;  %v781_v15 = vld [vmem:[%s2067_s9 + $0xe48] sm:$0xff]  ;;  %1078 = vmatprep.subr.mxu0 %v657_v7  ;;  %v780_v18 = vld [vmem:[%s2067_s9 + $0xe40] sm:$0xff]  ;;  %v370_v49 = vld [vmem:[%s2067_s9 + $0x170] sm:$0xff] }
  0xcc   : > { %1149 = vmatprep.subr.mxu1 %v785_v9  ;;  %1079 = vmatpush2.msra.mxu0 %v656_v12  ;;  %v649_v19 = vld [vmem:[%s2067_s9 + $0xa28] sm:$0xff]  ;;  %v648_v22 = vld [vmem:[%s2067_s9 + $0xa20] sm:$0xff]  ;;  %v498_v50 = vld [vmem:[%s2067_s9 + $0x570] sm:$0xff] }
  0xcd   : > { %1150 = vmatpush2.msra.mxu1 %v784_v13  ;;  %v777_v20 = vld [vmem:[%s2067_s9 + $0xe28] sm:$0xff]  ;;  %1080 = vmatprep.subr.mxu0 %v653_v14  ;;  %v776_v23 = vld [vmem:[%s2067_s9 + $0xe20] sm:$0xff]  ;;  %v367_v51 = vld [vmem:[%s2067_s9 + $0x158] sm:$0xff] }
  0xce   : > { %1151 = vmatprep.subr.mxu1 %v781_v15  ;;  %1081 = vmatpush2.msra.mxu0 %v652_v17  ;;  %v645_v24 = vld [vmem:[%s2067_s9 + $0xa08] sm:$0xff]  ;;  %v644_v27 = vld [vmem:[%s2067_s9 + $0xa00] sm:$0xff]  ;;  %v495_v53 = vld [vmem:[%s2067_s9 + $0x558] sm:$0xff] }
  0xcf   : > { %1152 = vmatpush2.msra.mxu1 %v780_v18  ;;  %v773_v25 = vld [vmem:[%s2067_s9 + $0xe08] sm:$0xff]  ;;  %1082 = vmatprep.subr.mxu0 %v649_v19  ;;  %v772_v28 = vld [vmem:[%s2067_s9 + $0xe00] sm:$0xff]  ;;  %v366_v54 = vld [vmem:[%s2067_s9 + $0x150] sm:$0xff] }
  0xd0   : > { %1153 = vmatprep.subr.mxu1 %v777_v20  ;;  %1083 = vmatpush2.msra.mxu0 %v648_v22  ;;  %v494_v55 = vld [vmem:[%s2067_s9 + $0x550] sm:$0xff]  ;;  %v363_v56 = vld [vmem:[%s2067_s9 + $0x138] sm:$0xff] }
  0xd1   : > { %1154 = vmatpush2.msra.mxu1 %v776_v23  ;;  %1084 = vmatprep.subr.mxu0 %v645_v24  ;;  %v491_v57 = vld [vmem:[%s2067_s9 + $0x538] sm:$0xff]  ;;  %v362_v58 = vld [vmem:[%s2067_s9 + $0x130] sm:$0xff] }
  0xd2   : > { %1155 = vmatprep.subr.mxu1 %v773_v25  ;;  %1085 = vmatpush2.msra.mxu0 %v644_v27  ;;  %v490_v59 = vld [vmem:[%s2067_s9 + $0x530] sm:$0xff]  ;;  %v359_v60 = vld [vmem:[%s2067_s9 + $0x118] sm:$0xff] }
  0xd3   : > { %1086 = vmatprep.mubr.f32.mxu0 %v2358_v26  ;;  %1156 = vmatpush2.msra.mxu1 %v772_v28  ;;  %v487_v61 = vld [vmem:[%s2067_s9 + $0x518] sm:$0xff]  ;;  %v358_v63 = vld [vmem:[%s2067_s9 + $0x110] sm:$0xff] }
  0xd4   : > { %1087 = vmatmul.mubr.f32.vlgmr.msra.gmra.mxu0 %v2343_v16  ;;  %1157 = vmatprep.mubr.f32.mxu1 %v2364_v29  ;;  %v486_v0 = vld [vmem:[%s2067_s9 + $0x510] sm:$0xff]  ;;  %v483_v3 = vld [vmem:[%s2067_s9 + $0x4f8] sm:$0xff] }
  0xd5   : > { %1164 = vmatprep.subr.mxu0 %v387_v30  ;;  %1235 = vmatprep.subr.mxu1 %v515_v31  ;;  %v354_v4 = vld [vmem:[%s2067_s9 + $0xf0] sm:$0xff]  ;;  %v351_v6 = vld [vmem:[%s2067_s9 + $0xd8] sm:$0xff] }
  0xd6   : > { %1158 = vmatmul.mubr.f32.vlgmr.msra.gmra.mxu1 %v2350_v21  ;;  %1165 = vmatpush1.msra.mxu0 %v386_v32  ;;  %v482_v5 = vld [vmem:[%s2067_s9 + $0x4f0] sm:$0xff]  ;;  %v479_v7 = vld [vmem:[%s2067_s9 + $0x4d8] sm:$0xff] }
  0xd7   : > { %1236 = vmatpush1.msra.mxu1 %v514_v33  ;;  %1166 = vmatprep.subr.mxu0 %v383_v34  ;;  %v350_v9 = vld [vmem:[%s2067_s9 + $0xd0] sm:$0xff]  ;;  %v347_v12 = vld [vmem:[%s2067_s9 + $0xb8] sm:$0xff] }
  0xd8   : > { %1237 = vmatprep.subr.mxu1 %v511_v35  ;;  %1167 = vmatpush1.msra.mxu0 %v382_v36  ;;  %v475_v13 = vld [vmem:[%s2067_s9 + $0x4b8] sm:$0xff]  ;;  %v346_v14 = vld [vmem:[%s2067_s9 + $0xb0] sm:$0xff] }
  0xd9   : > { %1238 = vmatpush1.msra.mxu1 %v510_v37  ;;  %1168 = vmatprep.subr.mxu0 %v379_v38  ;;  %v474_v15 = vld [vmem:[%s2067_s9 + $0x4b0] sm:$0xff]  ;;  %v343_v17 = vld [vmem:[%s2067_s9 + $0x98] sm:$0xff] }
  0xda   : > { %1239 = vmatprep.subr.mxu1 %v507_v39  ;;  %1169 = vmatpush1.msra.mxu0 %v378_v40  ;;  %v471_v18 = vld [vmem:[%s2067_s9 + $0x498] sm:$0xff]  ;;  %v342_v19 = vld [vmem:[%s2067_s9 + $0x90] sm:$0xff] }
  0xdb   : > { %1240 = vmatpush1.msra.mxu1 %v506_v42  ;;  %1170 = vmatprep.subr.mxu0 %v375_v43  ;;  %v470_v20 = vld [vmem:[%s2067_s9 + $0x490] sm:$0xff]  ;;  %v339_v22 = vld [vmem:[%s2067_s9 + $0x78] sm:$0xff] }
  0xdc   : > { %1241 = vmatprep.subr.mxu1 %v503_v44  ;;  %1171 = vmatpush1.msra.mxu0 %v374_v45  ;;  %v467_v23 = vld [vmem:[%s2067_s9 + $0x478] sm:$0xff]  ;;  %v338_v24 = vld [vmem:[%s2067_s9 + $0x70] sm:$0xff] }
  0xdd   : > { %1242 = vmatpush1.msra.mxu1 %v502_v46  ;;  %1172 = vmatprep.subr.mxu0 %v371_v47  ;;  %v466_v25 = vld [vmem:[%s2067_s9 + $0x470] sm:$0xff]  ;;  %v335_v27 = vld [vmem:[%s2067_s9 + $0x58] sm:$0xff] }
  0xde   : > { %1243 = vmatprep.subr.mxu1 %v499_v48  ;;  %1173 = vmatpush1.msra.mxu0 %v370_v49  ;;  %v463_v28 = vld [vmem:[%s2067_s9 + $0x458] sm:$0xff]  ;;  %v334_v30 = vld [vmem:[%s2067_s9 + $0x50] sm:$0xff] }
  0xdf   : > { %1244 = vmatpush1.msra.mxu1 %v498_v50  ;;  %1174 = vmatprep.subr.mxu0 %v367_v51  ;;  %v462_v31 = vld [vmem:[%s2067_s9 + $0x450] sm:$0xff]  ;;  %v331_v32 = vld [vmem:[%s2067_s9 + $0x38] sm:$0xff] }
  0xe0   : > { %1245 = vmatprep.subr.mxu1 %v495_v53  ;;  %1175 = vmatpush1.msra.mxu0 %v366_v54  ;;  %v459_v33 = vld [vmem:[%s2067_s9 + $0x438] sm:$0xff]  ;;  %v330_v34 = vld [vmem:[%s2067_s9 + $0x30] sm:$0xff] }
  0xe1   : > { %1246 = vmatpush1.msra.mxu1 %v494_v55  ;;  %1176 = vmatprep.subr.mxu0 %v363_v56  ;;  %v458_v35 = vld [vmem:[%s2067_s9 + $0x430] sm:$0xff]  ;;  %v327_v36 = vld [vmem:[%s2067_s9 + $0x18] sm:$0xff] }
  0xe2   : > { %1247 = vmatprep.subr.mxu1 %v491_v57  ;;  %1177 = vmatpush1.msra.mxu0 %v362_v58  ;;  %v455_v37 = vld [vmem:[%s2067_s9 + $0x418] sm:$0xff]  ;;  %v326_v38 = vld [vmem:[%s2067_s9 + $0x10] sm:$0xff] }
  0xe3   : > { %1248 = vmatpush1.msra.mxu1 %v490_v59  ;;  %1178 = vmatprep.subr.mxu0 %v359_v60  ;;  %v454_v39 = vld [vmem:[%s2067_s9 + $0x410] sm:$0xff]  ;;  %v451_v40 = vld [vmem:[%s2067_s9 + $0x3f8] sm:$0xff] }
  0xe4   : > { %1249 = vmatprep.subr.mxu1 %v487_v61  ;;  %1179 = vmatpush1.msra.mxu0 %v358_v63  ;;  %v579_v42 = vld [vmem:[%s2067_s9 + $0x7f8] sm:$0xff]  ;;  %v450_v43 = vld [vmem:[%s2067_s9 + $0x3f0] sm:$0xff] }
  0xe5   : > { %1250 = vmatpush1.msra.mxu1 %v486_v0  ;;  %1180 = vmatprep.subr.mxu0 %v355_v2  ;;  %v578_v44 = vld [vmem:[%s2067_s9 + $0x7f0] sm:$0xff]  ;;  %v447_v45 = vld [vmem:[%s2067_s9 + $0x3d8] sm:$0xff] }
  0xe6   : > { %1251 = vmatprep.subr.mxu1 %v483_v3  ;;  %1181 = vmatpush1.msra.mxu0 %v354_v4  ;;  %v575_v46 = vld [vmem:[%s2067_s9 + $0x7d8] sm:$0xff]  ;;  %v446_v47 = vld [vmem:[%s2067_s9 + $0x3d0] sm:$0xff] }
  0xe7   : > { %1252 = vmatpush1.msra.mxu1 %v482_v5  ;;  %1182 = vmatprep.subr.mxu0 %v351_v6  ;;  %v574_v48 = vld [vmem:[%s2067_s9 + $0x7d0] sm:$0xff]  ;;  %v443_v49 = vld [vmem:[%s2067_s9 + $0x3b8] sm:$0xff] }
  0xe8   : > { %1253 = vmatprep.subr.mxu1 %v479_v7  ;;  %1183 = vmatpush1.msra.mxu0 %v350_v9  ;;  %v571_v50 = vld [vmem:[%s2067_s9 + $0x7b8] sm:$0xff]  ;;  %v442_v51 = vld [vmem:[%s2067_s9 + $0x3b0] sm:$0xff] }
  0xe9   : > { %1254 = vmatpush1.msra.mxu1 %v478_v11  ;;  %1184 = vmatprep.subr.mxu0 %v347_v12  ;;  %v570_v53 = vld [vmem:[%s2067_s9 + $0x7b0] sm:$0xff]  ;;  %v439_v54 = vld [vmem:[%s2067_s9 + $0x398] sm:$0xff] }
  0xea   : > { %1255 = vmatprep.subr.mxu1 %v475_v13  ;;  %1185 = vmatpush1.msra.mxu0 %v346_v14  ;;  %v567_v55 = vld [vmem:[%s2067_s9 + $0x798] sm:$0xff]  ;;  %v438_v56 = vld [vmem:[%s2067_s9 + $0x390] sm:$0xff] }
  0xeb   : > { %1256 = vmatpush1.msra.mxu1 %v474_v15  ;;  %1186 = vmatprep.subr.mxu0 %v343_v17  ;;  %v566_v57 = vld [vmem:[%s2067_s9 + $0x790] sm:$0xff]  ;;  %v435_v58 = vld [vmem:[%s2067_s9 + $0x378] sm:$0xff] }
  0xec   : > { %1257 = vmatprep.subr.mxu1 %v471_v18  ;;  %1187 = vmatpush1.msra.mxu0 %v342_v19  ;;  %v563_v59 = vld [vmem:[%s2067_s9 + $0x778] sm:$0xff]  ;;  %v434_v60 = vld [vmem:[%s2067_s9 + $0x370] sm:$0xff] }
  0xed   : > { %1258 = vmatpush1.msra.mxu1 %v470_v20  ;;  %1188 = vmatprep.subr.mxu0 %v339_v22  ;;  %v562_v61 = vld [vmem:[%s2067_s9 + $0x770] sm:$0xff]  ;;  %v431_v63 = vld [vmem:[%s2067_s9 + $0x358] sm:$0xff] }
  0xee   : > { %1259 = vmatprep.subr.mxu1 %v467_v23  ;;  %1189 = vmatpush1.msra.mxu0 %v338_v24  ;;  %v559_v0 = vld [vmem:[%s2067_s9 + $0x758] sm:$0xff]  ;;  %v430_v2 = vld [vmem:[%s2067_s9 + $0x350] sm:$0xff] }
  0xef   : > { %1260 = vmatpush1.msra.mxu1 %v466_v25  ;;  %1190 = vmatprep.subr.mxu0 %v335_v27  ;;  %v558_v3 = vld [vmem:[%s2067_s9 + $0x750] sm:$0xff]  ;;  %v427_v4 = vld [vmem:[%s2067_s9 + $0x338] sm:$0xff] }
  0xf0   : > { %1261 = vmatprep.subr.mxu1 %v463_v28  ;;  %1191 = vmatpush1.msra.mxu0 %v334_v30  ;;  %v555_v5 = vld [vmem:[%s2067_s9 + $0x738] sm:$0xff]  ;;  %v426_v6 = vld [vmem:[%s2067_s9 + $0x330] sm:$0xff] }
  0xf1   : > { %1262 = vmatpush1.msra.mxu1 %v462_v31  ;;  %1192 = vmatprep.subr.mxu0 %v331_v32  ;;  %v554_v7 = vld [vmem:[%s2067_s9 + $0x730] sm:$0xff]  ;;  %v423_v9 = vld [vmem:[%s2067_s9 + $0x318] sm:$0xff] }
  0xf2   : > { %1263 = vmatprep.subr.mxu1 %v459_v33  ;;  %1193 = vmatpush1.msra.mxu0 %v330_v34  ;;  %v551_v11 = vld [vmem:[%s2067_s9 + $0x718] sm:$0xff]  ;;  %v422_v12 = vld [vmem:[%s2067_s9 + $0x310] sm:$0xff] }
  0xf3   : > { %1264 = vmatpush1.msra.mxu1 %v458_v35  ;;  %1194 = vmatprep.subr.mxu0 %v327_v36  ;;  %v550_v13 = vld [vmem:[%s2067_s9 + $0x710] sm:$0xff]  ;;  %v419_v14 = vld [vmem:[%s2067_s9 + $0x2f8] sm:$0xff] }
  0xf4   : > { %1265 = vmatprep.subr.mxu1 %v455_v37  ;;  %1195 = vmatpush1.msra.mxu0 %v326_v38  ;;  %v547_v15 = vld [vmem:[%s2067_s9 + $0x6f8] sm:$0xff]  ;;  %v418_v17 = vld [vmem:[%s2067_s9 + $0x2f0] sm:$0xff] }
  0xf5   : > { %1266 = vmatpush1.msra.mxu1 %v454_v39  ;;  %1196 = vmatprep.subr.mxu0 %v451_v40  ;;  %v546_v18 = vld [vmem:[%s2067_s9 + $0x6f0] sm:$0xff]  ;;  %v415_v19 = vld [vmem:[%s2067_s9 + $0x2d8] sm:$0xff] }
  0xf6   : > { %1267 = vmatprep.subr.mxu1 %v579_v42  ;;  %1197 = vmatpush2.msra.mxu0 %v450_v43  ;;  %v543_v20 = vld [vmem:[%s2067_s9 + $0x6d8] sm:$0xff]  ;;  %v414_v22 = vld [vmem:[%s2067_s9 + $0x2d0] sm:$0xff] }
  0xf7   : > { %1268 = vmatpush2.msra.mxu1 %v578_v44  ;;  %1198 = vmatprep.subr.mxu0 %v447_v45  ;;  %v542_v23 = vld [vmem:[%s2067_s9 + $0x6d0] sm:$0xff]  ;;  %v411_v24 = vld [vmem:[%s2067_s9 + $0x2b8] sm:$0xff] }
  0xf8   : > { %1269 = vmatprep.subr.mxu1 %v575_v46  ;;  %1199 = vmatpush2.msra.mxu0 %v446_v47  ;;  %v539_v25 = vld [vmem:[%s2067_s9 + $0x6b8] sm:$0xff]  ;;  %v410_v27 = vld [vmem:[%s2067_s9 + $0x2b0] sm:$0xff] }
  0xf9   : > { %1270 = vmatpush2.msra.mxu1 %v574_v48  ;;  %1200 = vmatprep.subr.mxu0 %v443_v49  ;;  %v538_v28 = vld [vmem:[%s2067_s9 + $0x6b0] sm:$0xff]  ;;  %v407_v30 = vld [vmem:[%s2067_s9 + $0x298] sm:$0xff] }
  0xfa   : > { %1271 = vmatprep.subr.mxu1 %v571_v50  ;;  %1201 = vmatpush2.msra.mxu0 %v442_v51  ;;  %v535_v31 = vld [vmem:[%s2067_s9 + $0x698] sm:$0xff]  ;;  %v406_v32 = vld [vmem:[%s2067_s9 + $0x290] sm:$0xff] }
  0xfb   : > { %1272 = vmatpush2.msra.mxu1 %v570_v53  ;;  %1202 = vmatprep.subr.mxu0 %v439_v54  ;;  %v534_v33 = vld [vmem:[%s2067_s9 + $0x690] sm:$0xff]  ;;  %v403_v34 = vld [vmem:[%s2067_s9 + $0x278] sm:$0xff] }
  0xfc   : > { %1273 = vmatprep.subr.mxu1 %v567_v55  ;;  %1203 = vmatpush2.msra.mxu0 %v438_v56  ;;  %v531_v35 = vld [vmem:[%s2067_s9 + $0x678] sm:$0xff]  ;;  %v402_v36 = vld [vmem:[%s2067_s9 + $0x270] sm:$0xff] }
  0xfd   : > { %1274 = vmatpush2.msra.mxu1 %v566_v57  ;;  %1204 = vmatprep.subr.mxu0 %v435_v58  ;;  %v530_v37 = vld [vmem:[%s2067_s9 + $0x670] sm:$0xff]  ;;  %v399_v38 = vld [vmem:[%s2067_s9 + $0x258] sm:$0xff] }
  0xfe   : > { %1275 = vmatprep.subr.mxu1 %v563_v59  ;;  %1205 = vmatpush2.msra.mxu0 %v434_v60  ;;  %v527_v39 = vld [vmem:[%s2067_s9 + $0x658] sm:$0xff]  ;;  %v398_v40 = vld [vmem:[%s2067_s9 + $0x250] sm:$0xff] }
  0xff   : > { %1276 = vmatpush2.msra.mxu1 %v562_v61  ;;  %1206 = vmatprep.subr.mxu0 %v431_v63  ;;  %v526_v42 = vld [vmem:[%s2067_s9 + $0x650] sm:$0xff]  ;;  %v395_v43 = vld [vmem:[%s2067_s9 + $0x238] sm:$0xff] }
 0x100   : > { %1277 = vmatprep.subr.mxu1 %v559_v0  ;;  %1207 = vmatpush2.msra.mxu0 %v430_v2  ;;  %v523_v44 = vld [vmem:[%s2067_s9 + $0x638] sm:$0xff]  ;;  %v394_v45 = vld [vmem:[%s2067_s9 + $0x230] sm:$0xff] }
 0x101   : > { %1278 = vmatpush2.msra.mxu1 %v558_v3  ;;  %1208 = vmatprep.subr.mxu0 %v427_v4  ;;  %v522_v46 = vld [vmem:[%s2067_s9 + $0x630] sm:$0xff]  ;;  %v391_v47 = vld [vmem:[%s2067_s9 + $0x218] sm:$0xff] }
 0x102   : > { %1279 = vmatprep.subr.mxu1 %v555_v5  ;;  %1209 = vmatpush2.msra.mxu0 %v426_v6  ;;  %v519_v48 = vld [vmem:[%s2067_s9 + $0x618] sm:$0xff]  ;;  %v390_v49 = vld [vmem:[%s2067_s9 + $0x210] sm:$0xff] }
 0x103   : > { %1280 = vmatpush2.msra.mxu1 %v554_v7  ;;  %1210 = vmatprep.subr.mxu0 %v423_v9  ;;  %v518_v50 = vld [vmem:[%s2067_s9 + $0x610] sm:$0xff]  ;;  %v643_v51 = vld [vmem:[%s2067_s9 + $0x9f8] sm:$0xff] }
 0x104   : > { %1281 = vmatprep.subr.mxu1 %v551_v11  ;;  %1211 = vmatpush2.msra.mxu0 %v422_v12  ;;  %v771_v53 = vld [vmem:[%s2067_s9 + $0xdf8] sm:$0xff]  ;;  %v642_v54 = vld [vmem:[%s2067_s9 + $0x9f0] sm:$0xff] }
 0x105   : > { %1282 = vmatpush2.msra.mxu1 %v550_v13  ;;  %1212 = vmatprep.subr.mxu0 %v419_v14  ;;  %v770_v55 = vld [vmem:[%s2067_s9 + $0xdf0] sm:$0xff]  ;;  %v639_v56 = vld [vmem:[%s2067_s9 + $0x9d8] sm:$0xff] }
 0x106   : > { %1283 = vmatprep.subr.mxu1 %v547_v15  ;;  %1213 = vmatpush2.msra.mxu0 %v418_v17  ;;  %v767_v57 = vld [vmem:[%s2067_s9 + $0xdd8] sm:$0xff]  ;;  %v766_v58 = vld [vmem:[%s2067_s9 + $0xdd0] sm:$0xff] }
 0x107   : > { %1284 = vmatpush2.msra.mxu1 %v546_v18  ;;  %1214 = vmatprep.subr.mxu0 %v415_v19  ;;  %v763_v59 = vld [vmem:[%s2067_s9 + $0xdb8] sm:$0xff]  ;;  %v630_v63 = vld [vmem:[%s2067_s9 + $0x990] sm:$0xff] }
 0x108   : > { %1285 = vmatprep.subr.mxu1 %v543_v20  ;;  %1215 = vmatpush2.msra.mxu0 %v414_v22  ;;  %v631_v60 = vld [vmem:[%s2067_s9 + $0x998] sm:$0xff]  ;;  %v758_v0 = vld [vmem:[%s2067_s9 + $0xd90] sm:$0xff] }
 0x109   : > { %1286 = vmatpush2.msra.mxu1 %v542_v23  ;;  %1216 = vmatprep.subr.mxu0 %v411_v24  ;;  %v759_v61 = vld [vmem:[%s2067_s9 + $0xd98] sm:$0xff]  ;;  %v626_v4 = vld [vmem:[%s2067_s9 + $0x970] sm:$0xff] }
 0x10a   : > { %1287 = vmatprep.subr.mxu1 %v539_v25  ;;  %1217 = vmatpush2.msra.mxu0 %v410_v27  ;;  %v627_v2 = vld [vmem:[%s2067_s9 + $0x978] sm:$0xff]  ;;  %v754_v5 = vld [vmem:[%s2067_s9 + $0xd70] sm:$0xff] }
 0x10b   : > { %1288 = vmatpush2.msra.mxu1 %v538_v28  ;;  %1218 = vmatprep.subr.mxu0 %v407_v30  ;;  %v755_v3 = vld [vmem:[%s2067_s9 + $0xd78] sm:$0xff]  ;;  %v622_v9 = vld [vmem:[%s2067_s9 + $0x950] sm:$0xff] }
 0x10c   : > { %1289 = vmatprep.subr.mxu1 %v535_v31  ;;  %1219 = vmatpush2.msra.mxu0 %v406_v32  ;;  %v623_v6 = vld [vmem:[%s2067_s9 + $0x958] sm:$0xff]  ;;  %v750_v11 = vld [vmem:[%s2067_s9 + $0xd50] sm:$0xff] }
 0x10d   : > { %1290 = vmatpush2.msra.mxu1 %v534_v33  ;;  %1220 = vmatprep.subr.mxu0 %v403_v34  ;;  %v751_v7 = vld [vmem:[%s2067_s9 + $0xd58] sm:$0xff]  ;;  %v618_v14 = vld [vmem:[%s2067_s9 + $0x930] sm:$0xff] }
 0x10e   : > { %1291 = vmatprep.subr.mxu1 %v531_v35  ;;  %1221 = vmatpush2.msra.mxu0 %v402_v36  ;;  %v619_v12 = vld [vmem:[%s2067_s9 + $0x938] sm:$0xff]  ;;  %v746_v15 = vld [vmem:[%s2067_s9 + $0xd30] sm:$0xff] }
 0x10f   : > { %1292 = vmatpush2.msra.mxu1 %v530_v37  ;;  %1222 = vmatprep.subr.mxu0 %v399_v38  ;;  %v747_v13 = vld [vmem:[%s2067_s9 + $0xd38] sm:$0xff]  ;;  %v614_v19 = vld [vmem:[%s2067_s9 + $0x910] sm:$0xff] }
 0x110   : > { %1293 = vmatprep.subr.mxu1 %v527_v39  ;;  %1223 = vmatpush2.msra.mxu0 %v398_v40  ;;  %v615_v17 = vld [vmem:[%s2067_s9 + $0x918] sm:$0xff]  ;;  %v742_v20 = vld [vmem:[%s2067_s9 + $0xd10] sm:$0xff] }
 0x111   : > { %1294 = vmatpush2.msra.mxu1 %v526_v42  ;;  %1224 = vmatprep.subr.mxu0 %v395_v43  ;;  %v743_v18 = vld [vmem:[%s2067_s9 + $0xd18] sm:$0xff]  ;;  %v610_v24 = vld [vmem:[%s2067_s9 + $0x8f0] sm:$0xff] }
 0x112   : > { %1295 = vmatprep.subr.mxu1 %v523_v44  ;;  %1225 = vmatpush2.msra.mxu0 %v394_v45  ;;  %v611_v22 = vld [vmem:[%s2067_s9 + $0x8f8] sm:$0xff]  ;;  %v738_v25 = vld [vmem:[%s2067_s9 + $0xcf0] sm:$0xff] }
 0x113   : > { %1296 = vmatpush2.msra.mxu1 %v522_v46  ;;  %1226 = vmatprep.subr.mxu0 %v391_v47  ;;  %v739_v23 = vld [vmem:[%s2067_s9 + $0xcf8] sm:$0xff]  ;;  %v606_v30 = vld [vmem:[%s2067_s9 + $0x8d0] sm:$0xff] }
 0x114   : > { %1297 = vmatprep.subr.mxu1 %v519_v48  ;;  %1227 = vmatpush2.msra.mxu0 %v390_v49  ;;  %v607_v27 = vld [vmem:[%s2067_s9 + $0x8d8] sm:$0xff]  ;;  %v734_v31 = vld [vmem:[%s2067_s9 + $0xcd0] sm:$0xff] }
 0x115   : > { %1228 = vmatprep.mubr.f32.mxu0 %v2212_v8  ;;  %1298 = vmatpush2.msra.mxu1 %v518_v50  ;;  %v638_v8 = vld [vmem:[%s2067_s9 + $0x9d0] sm:$0xff]  ;;  %v735_v28 = vld [vmem:[%s2067_s9 + $0xcd8] sm:$0xff] }
 0x116   : > { %1299 = vmatprep.mubr.f32.mxu1 %v2217_v10  ;;  %1229 = vmatmul.mubr.f32.vlgmr.msra.gmra.mxu0 %v2197_v62  ;;  %v635_v10 = vld [vmem:[%s2067_s9 + $0x9b8] sm:$0xff]  ;;  %v634_v62 = vld [vmem:[%s2067_s9 + $0x9b0] sm:$0xff] }
 0x117   : > { %1300 = vmatmul.mubr.f32.vlgmr.msra.gmra.mxu1 %v2202_v1  ;;  %1306 = vmatprep.subr.mxu0 %v643_v51  ;;  %v762_v1 = vld [vmem:[%s2067_s9 + $0xdb0] sm:$0xff]  ;;  %v603_v32 = vld [vmem:[%s2067_s9 + $0x8b8] sm:$0xff] }
 0x118   : > { %1377 = vmatprep.subr.mxu1 %v771_v53  ;;  %1307 = vmatpush1.msra.mxu0 %v642_v54  ;;  %v731_v33 = vld [vmem:[%s2067_s9 + $0xcb8] sm:$0xff]  ;;  %v602_v34 = vld [vmem:[%s2067_s9 + $0x8b0] sm:$0xff] }
 0x119   : > { %1378 = vmatpush1.msra.mxu1 %v770_v55  ;;  %1308 = vmatprep.subr.mxu0 %v639_v56  ;;  %v730_v35 = vld [vmem:[%s2067_s9 + $0xcb0] sm:$0xff]  ;;  %v599_v36 = vld [vmem:[%s2067_s9 + $0x898] sm:$0xff] }
 0x11a   : > { %1379 = vmatprep.subr.mxu1 %v767_v57  ;;  %1309 = vmatpush1.msra.mxu0 %v638_v8  ;;  %v727_v37 = vld [vmem:[%s2067_s9 + $0xc98] sm:$0xff]  ;;  %v598_v38 = vld [vmem:[%s2067_s9 + $0x890] sm:$0xff] }
 0x11b   : > { %1380 = vmatpush1.msra.mxu1 %v766_v58  ;;  %1310 = vmatprep.subr.mxu0 %v635_v10  ;;  %v726_v39 = vld [vmem:[%s2067_s9 + $0xc90] sm:$0xff]  ;;  %v595_v40 = vld [vmem:[%s2067_s9 + $0x878] sm:$0xff] }
 0x11c   : > { %1381 = vmatprep.subr.mxu1 %v763_v59  ;;  %1311 = vmatpush1.msra.mxu0 %v634_v62  ;;  %v723_v42 = vld [vmem:[%s2067_s9 + $0xc78] sm:$0xff]  ;;  %v594_v43 = vld [vmem:[%s2067_s9 + $0x870] sm:$0xff] }
 0x11d   : > { %1382 = vmatpush1.msra.mxu1 %v762_v1  ;;  %1312 = vmatprep.subr.mxu0 %v631_v60  ;;  %v722_v44 = vld [vmem:[%s2067_s9 + $0xc70] sm:$0xff]  ;;  %v591_v45 = vld [vmem:[%s2067_s9 + $0x858] sm:$0xff] }
 0x11e   : > { %1383 = vmatprep.subr.mxu1 %v759_v61  ;;  %1313 = vmatpush1.msra.mxu0 %v630_v63  ;;  %v719_v46 = vld [vmem:[%s2067_s9 + $0xc58] sm:$0xff]  ;;  %v590_v47 = vld [vmem:[%s2067_s9 + $0x850] sm:$0xff] }
 0x11f   : > { %1384 = vmatpush1.msra.mxu1 %v758_v0  ;;  %1314 = vmatprep.subr.mxu0 %v627_v2  ;;  %v718_v48 = vld [vmem:[%s2067_s9 + $0xc50] sm:$0xff]  ;;  %v587_v49 = vld [vmem:[%s2067_s9 + $0x838] sm:$0xff] }
 0x120   : > { %1385 = vmatprep.subr.mxu1 %v755_v3  ;;  %1315 = vmatpush1.msra.mxu0 %v626_v4  ;;  %v715_v50 = vld [vmem:[%s2067_s9 + $0xc38] sm:$0xff]  ;;  %v586_v51 = vld [vmem:[%s2067_s9 + $0x830] sm:$0xff] }
 0x121   : > { %1386 = vmatpush1.msra.mxu1 %v754_v5  ;;  %1316 = vmatprep.subr.mxu0 %v623_v6  ;;  %v714_v53 = vld [vmem:[%s2067_s9 + $0xc30] sm:$0xff]  ;;  %v583_v54 = vld [vmem:[%s2067_s9 + $0x818] sm:$0xff] }
 0x122   : > { %1387 = vmatprep.subr.mxu1 %v751_v7  ;;  %1317 = vmatpush1.msra.mxu0 %v622_v9  ;;  %v711_v55 = vld [vmem:[%s2067_s9 + $0xc18] sm:$0xff]  ;;  %v582_v56 = vld [vmem:[%s2067_s9 + $0x810] sm:$0xff] }
 0x123   : > { %1388 = vmatpush1.msra.mxu1 %v750_v11  ;;  %1318 = vmatprep.subr.mxu0 %v619_v12  ;;  %v710_v57 = vld [vmem:[%s2067_s9 + $0xc10] sm:$0xff]  ;;  %v707_v8 = vld [vmem:[%s2067_s9 + $0xbf8] sm:$0xff] }
 0x124   : > { %1389 = vmatprep.subr.mxu1 %v747_v13  ;;  %1319 = vmatpush1.msra.mxu0 %v618_v14  ;;  %v835_v58 = vld [vmem:[%s2067_s9 + $0xff8] sm:$0xff]  ;;  %v706_v10 = vld [vmem:[%s2067_s9 + $0xbf0] sm:$0xff] }
 0x125   : > { %1390 = vmatpush1.msra.mxu1 %v746_v15  ;;  %1320 = vmatprep.subr.mxu0 %v615_v17  ;;  %v834_v59 = vld [vmem:[%s2067_s9 + $0xff0] sm:$0xff]  ;;  %v703_v62 = vld [vmem:[%s2067_s9 + $0xbd8] sm:$0xff] }
 0x126   : > { %1391 = vmatprep.subr.mxu1 %v743_v18  ;;  %1321 = vmatpush1.msra.mxu0 %v614_v19  ;;  %v831_v1 = vld [vmem:[%s2067_s9 + $0xfd8] sm:$0xff]  ;;  %v702_v60 = vld [vmem:[%s2067_s9 + $0xbd0] sm:$0xff] }
 0x127   : > { %1392 = vmatpush1.msra.mxu1 %v742_v20  ;;  %1322 = vmatprep.subr.mxu0 %v611_v22  ;;  %v830_v61 = vld [vmem:[%s2067_s9 + $0xfd0] sm:$0xff]  ;;  %v699_v63 = vld [vmem:[%s2067_s9 + $0xbb8] sm:$0xff] }
 0x128   : > { %1393 = vmatprep.subr.mxu1 %v739_v23  ;;  %1323 = vmatpush1.msra.mxu0 %v610_v24  ;;  %v827_v0 = vld [vmem:[%s2067_s9 + $0xfb8] sm:$0xff]  ;;  %v698_v2 = vld [vmem:[%s2067_s9 + $0xbb0] sm:$0xff] }
 0x129   : > { %1394 = vmatpush1.msra.mxu1 %v738_v25  ;;  %1324 = vmatprep.subr.mxu0 %v607_v27  ;;  %v826_v3 = vld [vmem:[%s2067_s9 + $0xfb0] sm:$0xff]  ;;  %v695_v4 = vld [vmem:[%s2067_s9 + $0xb98] sm:$0xff] }
 0x12a   : > { %1395 = vmatprep.subr.mxu1 %v735_v28  ;;  %1325 = vmatpush1.msra.mxu0 %v606_v30  ;;  %v823_v5 = vld [vmem:[%s2067_s9 + $0xf98] sm:$0xff]  ;;  %v694_v6 = vld [vmem:[%s2067_s9 + $0xb90] sm:$0xff] }
 0x12b   : > { %1396 = vmatpush1.msra.mxu1 %v734_v31  ;;  %1326 = vmatprep.subr.mxu0 %v603_v32  ;;  %v822_v7 = vld [vmem:[%s2067_s9 + $0xf90] sm:$0xff]  ;;  %v691_v9 = vld [vmem:[%s2067_s9 + $0xb78] sm:$0xff] }
 0x12c   : > { %1397 = vmatprep.subr.mxu1 %v731_v33  ;;  %1327 = vmatpush1.msra.mxu0 %v602_v34  ;;  %v819_v11 = vld [vmem:[%s2067_s9 + $0xf78] sm:$0xff]  ;;  %v690_v12 = vld [vmem:[%s2067_s9 + $0xb70] sm:$0xff] }
 0x12d   : > { %1398 = vmatpush1.msra.mxu1 %v730_v35  ;;  %1328 = vmatprep.subr.mxu0 %v599_v36  ;;  %v818_v13 = vld [vmem:[%s2067_s9 + $0xf70] sm:$0xff]  ;;  %v687_v14 = vld [vmem:[%s2067_s9 + $0xb58] sm:$0xff] }
 0x12e   : > { %1399 = vmatprep.subr.mxu1 %v727_v37  ;;  %1329 = vmatpush1.msra.mxu0 %v598_v38  ;;  %v815_v15 = vld [vmem:[%s2067_s9 + $0xf58] sm:$0xff]  ;;  %v686_v17 = vld [vmem:[%s2067_s9 + $0xb50] sm:$0xff] }
 0x12f   : > { %1400 = vmatpush1.msra.mxu1 %v726_v39  ;;  %1330 = vmatprep.subr.mxu0 %v595_v40  ;;  %v814_v18 = vld [vmem:[%s2067_s9 + $0xf50] sm:$0xff]  ;;  %v683_v19 = vld [vmem:[%s2067_s9 + $0xb38] sm:$0xff] }
 0x130   : > { %1401 = vmatprep.subr.mxu1 %v723_v42  ;;  %1331 = vmatpush1.msra.mxu0 %v594_v43  ;;  %v811_v20 = vld [vmem:[%s2067_s9 + $0xf38] sm:$0xff]  ;;  %v682_v22 = vld [vmem:[%s2067_s9 + $0xb30] sm:$0xff] }
 0x131   : > { %1402 = vmatpush1.msra.mxu1 %v722_v44  ;;  %1332 = vmatprep.subr.mxu0 %v591_v45  ;;  %v810_v23 = vld [vmem:[%s2067_s9 + $0xf30] sm:$0xff]  ;;  %v679_v24 = vld [vmem:[%s2067_s9 + $0xb18] sm:$0xff] }
 0x132   : > { %1403 = vmatprep.subr.mxu1 %v719_v46  ;;  %1333 = vmatpush1.msra.mxu0 %v590_v47  ;;  %v807_v25 = vld [vmem:[%s2067_s9 + $0xf18] sm:$0xff]  ;;  %v678_v27 = vld [vmem:[%s2067_s9 + $0xb10] sm:$0xff] }
 0x133   : > { %1404 = vmatpush1.msra.mxu1 %v718_v48  ;;  %1334 = vmatprep.subr.mxu0 %v587_v49  ;;  %v806_v28 = vld [vmem:[%s2067_s9 + $0xf10] sm:$0xff]  ;;  %v675_v30 = vld [vmem:[%s2067_s9 + $0xaf8] sm:$0xff] }
 0x134   : > { %1405 = vmatprep.subr.mxu1 %v715_v50  ;;  %1335 = vmatpush1.msra.mxu0 %v586_v51  ;;  %v803_v31 = vld [vmem:[%s2067_s9 + $0xef8] sm:$0xff]  ;;  %v674_v32 = vld [vmem:[%s2067_s9 + $0xaf0] sm:$0xff] }
 0x135   : > { %1406 = vmatpush1.msra.mxu1 %v714_v53  ;;  %1336 = vmatprep.subr.mxu0 %v583_v54  ;;  %v802_v33 = vld [vmem:[%s2067_s9 + $0xef0] sm:$0xff]  ;;  %v671_v34 = vld [vmem:[%s2067_s9 + $0xad8] sm:$0xff] }
 0x136   : > { %1407 = vmatprep.subr.mxu1 %v711_v55  ;;  %1337 = vmatpush1.msra.mxu0 %v582_v56  ;;  %v799_v35 = vld [vmem:[%s2067_s9 + $0xed8] sm:$0xff]  ;;  %v670_v36 = vld [vmem:[%s2067_s9 + $0xad0] sm:$0xff] }
 0x137   : > { %1408 = vmatpush1.msra.mxu1 %v710_v57  ;;  %1338 = vmatprep.subr.mxu0 %v707_v8  ;;  %v798_v37 = vld [vmem:[%s2067_s9 + $0xed0] sm:$0xff]  ;;  %v667_v38 = vld [vmem:[%s2067_s9 + $0xab8] sm:$0xff] }
 0x138   : > { %1409 = vmatprep.subr.mxu1 %v835_v58  ;;  %1339 = vmatpush2.msra.mxu0 %v706_v10  ;;  %v795_v39 = vld [vmem:[%s2067_s9 + $0xeb8] sm:$0xff]  ;;  %v666_v40 = vld [vmem:[%s2067_s9 + $0xab0] sm:$0xff] }
 0x139   : > { %1410 = vmatpush2.msra.mxu1 %v834_v59  ;;  %1340 = vmatprep.subr.mxu0 %v703_v62  ;;  %v794_v42 = vld [vmem:[%s2067_s9 + $0xeb0] sm:$0xff]  ;;  %v663_v43 = vld [vmem:[%s2067_s9 + $0xa98] sm:$0xff] }
 0x13a   : > { %1411 = vmatprep.subr.mxu1 %v831_v1  ;;  %1341 = vmatpush2.msra.mxu0 %v702_v60  ;;  %v791_v44 = vld [vmem:[%s2067_s9 + $0xe98] sm:$0xff]  ;;  %v662_v45 = vld [vmem:[%s2067_s9 + $0xa90] sm:$0xff] }
 0x13b   : > { %1412 = vmatpush2.msra.mxu1 %v830_v61  ;;  %1342 = vmatprep.subr.mxu0 %v699_v63  ;;  %v790_v46 = vld [vmem:[%s2067_s9 + $0xe90] sm:$0xff]  ;;  %v659_v47 = vld [vmem:[%s2067_s9 + $0xa78] sm:$0xff] }
 0x13c   : > { %1413 = vmatprep.subr.mxu1 %v827_v0  ;;  %1343 = vmatpush2.msra.mxu0 %v698_v2  ;;  %v787_v48 = vld [vmem:[%s2067_s9 + $0xe78] sm:$0xff]  ;;  %v658_v49 = vld [vmem:[%s2067_s9 + $0xa70] sm:$0xff] }
 0x13d   : > { %1414 = vmatpush2.msra.mxu1 %v826_v3  ;;  %1344 = vmatprep.subr.mxu0 %v695_v4  ;;  %v786_v50 = vld [vmem:[%s2067_s9 + $0xe70] sm:$0xff]  ;;  %v655_v51 = vld [vmem:[%s2067_s9 + $0xa58] sm:$0xff] }
 0x13e   : > { %1415 = vmatprep.subr.mxu1 %v823_v5  ;;  %1345 = vmatpush2.msra.mxu0 %v694_v6  ;;  %v783_v53 = vld [vmem:[%s2067_s9 + $0xe58] sm:$0xff]  ;;  %v654_v54 = vld [vmem:[%s2067_s9 + $0xa50] sm:$0xff]  ;;  %v288_v6 = vsub.s32 0, %v2175_v41 }
 0x13f   : > { %1416 = vmatpush2.msra.mxu1 %v822_v7  ;;  %1346 = vmatprep.subr.mxu0 %v691_v9  ;;  %v782_v55 = vld [vmem:[%s2067_s9 + $0xe50] sm:$0xff]  ;;  %v651_v56 = vld [vmem:[%s2067_s9 + $0xa38] sm:$0xff]  ;;  %v296_v7 = vsub.s32 2, %v2175_v41 }
 0x140   : > { %1417 = vmatprep.subr.mxu1 %v819_v11  ;;  %1347 = vmatpush2.msra.mxu0 %v690_v12  ;;  %v779_v57 = vld [vmem:[%s2067_s9 + $0xe38] sm:$0xff]  ;;  %v650_v8 = vld [vmem:[%s2067_s9 + $0xa30] sm:$0xff]  ;;  %v284_v11 = vld [vmem:[%s247_s23] sm:$0xf] }
 0x141   : > { %1418 = vmatpush2.msra.mxu1 %v818_v13  ;;  %1348 = vmatprep.subr.mxu0 %v687_v14  ;;  %v778_v58 = vld [vmem:[%s2067_s9 + $0xe30] sm:$0xff]  ;;  %v647_v10 = vld [vmem:[%s2067_s9 + $0xa18] sm:$0xff]  ;;  %v289_v14 = vrot.slane %v284_v11, %v288_v6 }
 0x142   : > { %1419 = vmatprep.subr.mxu1 %v815_v15  ;;  %1349 = vmatpush2.msra.mxu0 %v686_v17  ;;  %v775_v59 = vld [vmem:[%s2067_s9 + $0xe18] sm:$0xff]  ;;  %v646_v62 = vld [vmem:[%s2067_s9 + $0xa10] sm:$0xff]  ;;  %v297_v17 = vrot.slane %v284_v11, %v296_v7 }
 0x143   : > { %1420 = vmatpush2.msra.mxu1 %v814_v18  ;;  %1350 = vmatprep.subr.mxu0 %v683_v19  ;;  %v774_v1 = vld [vmem:[%s2067_s9 + $0xe10] sm:$0xff] }
 0x144   : > { %1421 = vmatprep.subr.mxu1 %v811_v20  ;;  %1351 = vmatpush2.msra.mxu0 %v682_v22 }
 0x145   : > { %1422 = vmatpush2.msra.mxu1 %v810_v23  ;;  %1352 = vmatprep.subr.mxu0 %v679_v24 }
 0x146   : > { %1423 = vmatprep.subr.mxu1 %v807_v25  ;;  %1353 = vmatpush2.msra.mxu0 %v678_v27 }
 0x147   : > { %1424 = vmatpush2.msra.mxu1 %v806_v28  ;;  %1354 = vmatprep.subr.mxu0 %v675_v30 }
 0x148   : > { %1425 = vmatprep.subr.mxu1 %v803_v31  ;;  %1355 = vmatpush2.msra.mxu0 %v674_v32 }
 0x149   : > { %1426 = vmatpush2.msra.mxu1 %v802_v33  ;;  %1356 = vmatprep.subr.mxu0 %v671_v34 }
 0x14a   : > { %1427 = vmatprep.subr.mxu1 %v799_v35  ;;  %1357 = vmatpush2.msra.mxu0 %v670_v36 }
 0x14b   : > { %1428 = vmatpush2.msra.mxu1 %v798_v37  ;;  %1358 = vmatprep.subr.mxu0 %v667_v38 }
 0x14c   : > { %1429 = vmatprep.subr.mxu1 %v795_v39  ;;  %1359 = vmatpush2.msra.mxu0 %v666_v40 }
 0x14d   : > { %1430 = vmatpush2.msra.mxu1 %v794_v42  ;;  %1360 = vmatprep.subr.mxu0 %v663_v43 }
 0x14e   : > { %1431 = vmatprep.subr.mxu1 %v791_v44  ;;  %1361 = vmatpush2.msra.mxu0 %v662_v45 }
 0x14f   : > { %1432 = vmatpush2.msra.mxu1 %v790_v46  ;;  %1362 = vmatprep.subr.mxu0 %v659_v47 }
 0x150   : > { %1433 = vmatprep.subr.mxu1 %v787_v48  ;;  %1363 = vmatpush2.msra.mxu0 %v658_v49 }
 0x151   : > { %1434 = vmatpush2.msra.mxu1 %v786_v50  ;;  %1364 = vmatprep.subr.mxu0 %v655_v51 }
 0x152   : > { %1435 = vmatprep.subr.mxu1 %v783_v53  ;;  %1365 = vmatpush2.msra.mxu0 %v654_v54  ;;  %v946_v60 = vpop.f32.mrf.mxu0 }
 0x153   : > { %1436 = vmatpush2.msra.mxu1 %v782_v55  ;;  %1366 = vmatprep.subr.mxu0 %v651_v56  ;;  %v1017_v61 = vpop.f32.mrf.mxu1 }
 0x154   : > { %1437 = vmatprep.subr.mxu1 %v779_v57  ;;  %1367 = vmatpush2.msra.mxu0 %v650_v8  ;;  %v948_v63 = vpop.f32.mrf.mxu0  ;;  %v1018_v12 = vadd.f32 %v1017_v61, %v946_v60 }
 0x155   : > { %1438 = vmatpush2.msra.mxu1 %v778_v58  ;;  %1368 = vmatprep.subr.mxu0 %v647_v10  ;;  %v1019_v0 = vpop.f32.mrf.mxu1 }
 0x156   : > { %1439 = vmatprep.subr.mxu1 %v775_v59  ;;  %1369 = vmatpush2.msra.mxu0 %v646_v62 }
 0x157   : > { %1370 = vmatprep.mubr.f32.mxu0 %v2358_v26  ;;  %1440 = vmatpush2.msra.mxu1 %v774_v1  ;;  %v292_v26 = vsub.s32 1, %v2175_v41 }
 0x158   : > { %1441 = vmatprep.mubr.f32.mxu1 %v2364_v29  ;;  %1371 = vmatmul.mubr.f32.vlgmr.msra.gmra.mxu0 %v2343_v16  ;;  %v300_v29 = vsub.s32 3, %v2175_v41  ;;  %v1020_v16 = vadd.f32 %v1019_v0, %v948_v63 }
 0x159   : > { %1442 = vmatmul.mubr.f32.vlgmr.msra.gmra.mxu1 %v2350_v21  ;;  %v293_v15 = vrot.slane %v284_v11, %v292_v26 }
 0x15a   : > { %v301_v18 = vrot.slane %v284_v11, %v300_v29 }
 0x15b   : > { %v302_v30 = vcombine.low %v289_v14, %v293_v15 }
 0x15c   : > { %v303_v31 = vcombine.low %v297_v17, %v301_v18 }
 0x15d   : > { %v310_v38 = vrot.slane %v302_v30, %v2186_v52 }
 0x15e   : > { %v317_v39 = vrot.slane %v303_v31, %v2186_v52 }
 0x160   : > { %v318_v44 = vcombine.low %v310_v38, %v317_v39 }
 0x194   : > { %v1088_v2 = vpop.f32.mrf.mxu0 }
 0x195   : > { %v1089_v19 = vadd.f32 %v1088_v2, %v1018_v12 }
 0x196   : > { %v1159_v3 = vpop.f32.mrf.mxu1  ;;  %v1090_v4 = vpop.f32.mrf.mxu0 }
 0x197   : > { %v1091_v13 = vadd.f32 %v1090_v4, %v1020_v16  ;;  %v1160_v32 = vadd.f32 %v1159_v3, %v1089_v19 }
 0x198   : > { %v1161_v5 = vpop.f32.mrf.mxu1 }
 0x199   : > { %v1162_v24 = vadd.f32 %v1161_v5, %v1091_v13 }
 0x19b   : > { %v1452_v35 = vcombine.low %v1160_v32, %v1162_v24 }
 0x19d   : > { %v1460_v43 = vrot.slane %v1452_v35, %v2186_v52 }
 0x1d6   : > { %v1230_v9 = vpop.f32.mrf.mxu0 }
 0x1d7   : > { %v1301_v21 = vpop.f32.mrf.mxu1 }
 0x1d8   : > { %v1232_v20 = vpop.f32.mrf.mxu0  ;;  %v1302_v23 = vadd.f32 %v1301_v21, %v1230_v9 }
 0x1d9   : > { %v1303_v22 = vpop.f32.mrf.mxu1 }
 0x1da   : > { %v1304_v41 = vadd.f32 %v1303_v22, %v1232_v20 }
 0x218   : > { %v1372_v25 = vpop.f32.mrf.mxu0 }
 0x219   : > { %v1443_v27 = vpop.f32.mrf.mxu1  ;;  %v1373_v28 = vadd.f32 %v1372_v25, %v1302_v23 }
 0x21a   : > { %v1374_v33 = vpop.f32.mrf.mxu0 }
 0x21b   : > { %v1375_v34 = vadd.f32 %v1374_v33, %v1304_v41  ;;  %v1445_v36 = vpop.f32.mrf.mxu1  ;;  %v1444_v37 = vadd.f32 %v1443_v27, %v1373_v28 }
 0x21d   : > { %v1446_v40 = vadd.f32 %v1445_v36, %v1375_v34 }
 0x21f   : > { %v1453_v42 = vcombine.low %v1444_v37, %v1446_v40 }
 0x221   : > { %v1467_v45 = vrot.slane %v1453_v42, %v2186_v52 }
 0x223   : > { %v1468_v46 = vcombine.low %v1460_v43, %v1467_v45 }
 0x225   : > { %v1470_v47 = vadd.f32 %v1468_v46, %v318_v44 }
 0x227   : > { %1476 = vst [vmem:[%s274_s10] sm:$0xff] %v1470_v47 }
 0x228   : > { %1821 = shalt.err (!%p1818_p6)
}
 0x229   : > { %s1822_s5 = scalar_lea.hbm %s1492_s21, 128  ;;  %s1826_s8 = scalar_lea.hbm %s2687_s3, 256 }
 0x22a   : > { %p1823_p9 = scmp.ne.s32.totalorder %s1492_s21, %s1822_s5  ;;  %p1827_p7 = scmp.lt.s32.totalorder %s1492_s21, %s2687_s3 }
 0x22b   : > { %p1828_p12 = scmp.lt.s32.totalorder %s1826_s8, %s1822_s5 }
 0x22c   : > { %p1824_p3 = pnand %p1823_p9, %p2702_p2 }
 0x22d   : > { %p1829_p5 = por %p1828_p12, %p1827_p7 }
 0x22e   : > { %p1825_p13 = pneg %p1824_p3 }
 0x230   : > { %p1830_p10 = pnand %p1829_p5, %p1825_p13 }
 0x232   : > { %1833 = shalt.err (!%p1830_p10)
}
 0x233   : > { %1650 = dma.vmem_to_hbm [thread:$0]  (%p2702_p2), %s1495_s11, 128, %s1492_s21, %s1478_s30  }
 0x234 PF: > { %s1506_s23 = sand.u32 1, %s1872_s12   ;;  %p2703_p4 = scmp.ne.s32.totalorder %s2696_s26, 0 }
 0x235   : > { %p2704_p11 = scmp.ge.s32.totalorder %s1892_s17, 2  ;;  %s1507_s28 = scalar_lea.sflag [#allocation5], %s1506_s23 }
 0x237   : > { %p1664_p0 = pnand %p2704_p11, %p2703_p4 }
 0x239   : > { %p1665_p8 = pneg %p1664_p0 }
 0x23b   : > { %1867 = dma.done.wait (%p1665_p8), %s1507_s28, 128  }
 0x23c   : > { %1869 = vsyncadd (%p1665_p8), %s1507_s28, 4294967168  ;;  %s20_s17 = sadd.s32 1, %s1892_s17   ;;  %s2705_s12 = smov %s1876_s13 }
 0x23d   : > { %p17_p1 = scmp.ge.s32.totalorder %s20_s17, 4   ;;  %s2706_s13 = smov %s1880_s14 }
 0x23e   : > { %s2707_s14 = smov %s1970_s24  ;;  %s2708_s15 = smov %s1888_s16 }
 0x23f   : > { %s2709_s16 = smov %s2711_s18  ;;  %19 = sbr.rel (!%p17_p1) target bundleno = 9 (0x9), region = 102 }
 0x244   :  { %1512 = vsyncpa [#allocation4], 1 }
 0x245   :  { %1514 = vsyncpa [#allocation4 + $0x1], 1 }
 0x246   :  { %1515 = vsyncpa [#allocation7], 1 }
 0x247   :  { %1517 = vsyncpa [#allocation7 + $0x1], 1 }
 0x248   :  { %1518 = vsyncpa [#allocation5], 1 }
 0x249   :  { %1520 = vsyncpa [#allocation5 + $0x1], 1 }

</bundles_post_ra>
